<compile_context>
chip_gen: v6e
topology: v6e:2x2x1
jax: 0.10.0
libtpu: 0.0.40
codegen_flags: <defaults>
</compile_context>

<pallas_src>
import functools
import math
from typing import NamedTuple

import jax
import jax.numpy as jnp
import numpy as np
from jax.experimental import pallas as pl
from jax.experimental.pallas import tpu as pltpu


def _round_up(x, m):
    return (x + m - 1) // m * m


class SplAtCfg(NamedTuple):
    in_channels: int
    channels: int
    kernel_size: int = 3
    stride: int = 1
    padding: int = 1
    groups: int = 2
    radix: int = 2
    reduction_factor: int = 4

    @property
    def inter_channels(self):
        return max(self.in_channels * self.radix // self.reduction_factor, 32)


# ----------------------------------------------------------------------------
# Kernel A: grouped conv (im2col matmul, bf16 MXU) + ReLU + pooled column sums
# ----------------------------------------------------------------------------
def _conv_relu_pool_kernel(a_ref, w_ref, y_ref, gap_ref):
    sp = pl.program_id(1)
    kk = pl.program_id(2)
    nk = pl.num_programs(2)

    @pl.when(jnp.logical_and(sp == 0, kk == 0))
    def _():
        gap_ref[...] = jnp.zeros_like(gap_ref)

    @pl.when(kk == 0)
    def _():
        y_ref[...] = jnp.zeros_like(y_ref)

    # Accumulate directly in the block-resident f32 output (no acc scratch).
    y_ref[...] += jnp.dot(a_ref[...], w_ref[...],
                          preferred_element_type=jnp.float32)

    @pl.when(kk == nk - 1)
    def _():
        y = jnp.maximum(y_ref[...], 0.0)               # fused ReLU epilogue
        y_ref[...] = y
        # Partial global-average-pool: accumulate per-channel column sums.
        gap_ref[...] += jnp.sum(y, axis=0, keepdims=True)


# ----------------------------------------------------------------------------
# Kernel B: squeeze-excite tail + radix-2 softmax + split-attention combine
# ----------------------------------------------------------------------------
def _attn_combine_kernel(gap_ref, w1_ref, b1_ref, w2_ref, b2_ref, y_ref,
                         out_ref, *, channels, inv_hw):
    gs = gap_ref[...]                                         # (1, 2*channels)
    # radix sum + spatial mean (adaptive_avg_pool2d to 1x1)
    g = (gs[:, :channels] + gs[:, channels:2 * channels]) * inv_hw   # (1, ch)
    # grouped fc1 (block-diag weight) + bias + ReLU
    h = jnp.dot(g, w1_ref[...], preferred_element_type=jnp.float32) + b1_ref[...]
    h = jnp.maximum(h, 0.0)
    # grouped fc2 (block-diag weight, columns pre-permuted to split layout)
    att = jnp.dot(h, w2_ref[...], preferred_element_type=jnp.float32) + b2_ref[...]
    a0 = att[:, :channels]
    a1 = att[:, channels:2 * channels]
    # radix-2 softmax: w0 = sigmoid(a0 - a1), w1 = 1 - w0
    w0 = 1.0 / (1.0 + jnp.exp(a1 - a0))
    y = y_ref[...]                                            # (TS, 2*channels)
    out_ref[...] = (w0 * y[:, :channels]
                    + (1.0 - w0) * y[:, channels:2 * channels])


# ----------------------------------------------------------------------------
# Layout glue (all traced under the single jit)
# ----------------------------------------------------------------------------
def _im2col_nhwc(x_nhwc, KH, KW, stride, padding):
    B, H, W, C = x_nhwc.shape
    sh, sw = stride
    ph, pw = padding
    xp = jnp.pad(x_nhwc, ((0, 0), (ph, ph), (pw, pw), (0, 0)))
    Hp, Wp = xp.shape[1], xp.shape[2]
    OH = (Hp - KH) // sh + 1
    OW = (Wp - KW) // sw + 1
    patches = []
    for kh in range(KH):
        for kw in range(KW):
            patches.append(xp[:, kh:kh + sh * OH:sh, kw:kw + sw * OW:sw, :])
    A = jnp.concatenate(patches, axis=-1)        # K index = (kh*KW+kw)*C + cin
    return A.reshape(B, OH * OW, KH * KW * C), OH, OW


def prepare_params(raw, cfg: SplAtCfg):
    """Repack PyTorch-layout weights once into matmul-ready form."""
    c = cfg
    Cout = c.channels * c.radix
    Gc = c.groups * c.radix
    Cin_g = c.in_channels // Gc
    Cout_g = Cout // Gc
    KH = KW = c.kernel_size
    K = KH * KW * c.in_channels
    K_pad = _round_up(K, 128)

    # conv weight (Cout, Cin_g, KH, KW) -> (K_pad, Cout) with the grouped
    # block structure, K ordering matching the NHWC im2col above.
    wt = jnp.transpose(raw["conv_w"], (2, 3, 1, 0)).reshape(KH * KW, Cin_g, Cout)
    Wc = jnp.zeros((KH * KW, c.in_channels, Cout), jnp.float32)
    for g in range(Gc):
        Wc = Wc.at[:, g * Cin_g:(g + 1) * Cin_g,
                   g * Cout_g:(g + 1) * Cout_g].set(
                       wt[:, :, g * Cout_g:(g + 1) * Cout_g])
    Wc = Wc.reshape(K, Cout)
    Wc = jnp.pad(Wc, ((0, K_pad - K), (0, 0))).astype(jnp.bfloat16)

    inter = c.inter_channels
    ch_g = c.channels // c.groups
    int_g = inter // c.groups
    co2_g = Cout // c.groups

    # fc1: Conv2d(channels, inter, 1, groups) -> (channels, inter) block-diag
    w1 = raw["fc1_w"][:, :, 0, 0]
    W1 = jnp.zeros((c.channels, inter), jnp.float32)
    for g in range(c.groups):
        W1 = W1.at[g * ch_g:(g + 1) * ch_g,
                   g * int_g:(g + 1) * int_g].set(
                       w1[g * int_g:(g + 1) * int_g].T)
    b1 = raw["fc1_b"].reshape(1, inter).astype(jnp.float32)

    # fc2: Conv2d(inter, channels*radix, 1, groups) -> (inter, Cout) block-diag,
    # columns permuted from (ch*radix + r) order into split order (r*ch + ch)
    # so the radix softmax / combine use contiguous lane slices.
    w2 = raw["fc2_w"][:, :, 0, 0]
    W2 = jnp.zeros((inter, Cout), jnp.float32)
    for g in range(c.groups):
        W2 = W2.at[g * int_g:(g + 1) * int_g,
                   g * co2_g:(g + 1) * co2_g].set(
                       w2[g * co2_g:(g + 1) * co2_g].T)
    perm = np.array([(j % c.channels) * c.radix + (j // c.channels)
                     for j in range(Cout)])
    W2p = W2[:, perm]
    b2p = raw["fc2_b"][perm].reshape(1, Cout).astype(jnp.float32)

    return {"Wc": Wc, "W1": W1, "b1": b1, "W2": W2p, "b2": b2p}


# ----------------------------------------------------------------------------
# Forward (single jit over the whole module)
# ----------------------------------------------------------------------------
@functools.partial(jax.jit, static_argnums=(2,))
def splat_conv2d_forward(params, x_nchw, cfg: SplAtCfg):
    c = cfg
    assert c.radix == 2, "radix-2 split attention only"
    # TODO(synk): conv bias (bias=True) and norm_layer/BN paths not implemented;
    # the module defaults (bias=False, norm_layer=None) are what is modeled.
    B, Cin, H, W = x_nchw.shape
    Cout = c.channels * c.radix
    KH = KW = c.kernel_size
    K = KH * KW * Cin
    K_pad = params["Wc"].shape[0]
    TK = 128
    n_k = K_pad // TK

    # ---- glue: NHWC + im2col + padding, fused by XLA under this jit -------
    x = jnp.transpose(x_nchw, (0, 2, 3, 1)).astype(jnp.float32)
    A, OH, OW = _im2col_nhwc(x, KH, KW, (c.stride, c.stride),
                             (c.padding, c.padding))
    OHW = OH * OW
    TS = min(512, _round_up(OHW, 8))
    n_sp = (OHW + TS - 1) // TS
    M_pad = n_sp * TS
    A = jnp.pad(A, ((0, 0), (0, M_pad - OHW), (0, K_pad - K))).astype(jnp.bfloat16)

    # ---- kernel A: grouped conv + ReLU + pooled column sums ---------------
    y, gap_sum = pl.pallas_call(
        _conv_relu_pool_kernel,
        grid=(B, n_sp, n_k),
        in_specs=[
            pl.BlockSpec((None, TS, TK), lambda b, s, k: (b, s, k)),
            pl.BlockSpec((TK, Cout), lambda b, s, k: (k, 0)),
        ],
        out_specs=[
            pl.BlockSpec((None, TS, Cout), lambda b, s, k: (b, s, 0)),
            pl.BlockSpec((None, 1, Cout), lambda b, s, k: (b, 0, 0)),
        ],
        out_shape=[
            jax.ShapeDtypeStruct((B, M_pad, Cout), jnp.float32),
            jax.ShapeDtypeStruct((B, 1, Cout), jnp.float32),
        ],
        compiler_params=pltpu.CompilerParams(
            dimension_semantics=("parallel", "arbitrary", "arbitrary")),
    )(A, params["Wc"])

    # ---- kernel B: attention tail + split-attention combine ---------------
    inter = params["W1"].shape[1]
    kernel_b = functools.partial(_attn_combine_kernel,
                                 channels=c.channels, inv_hw=1.0 / float(OHW))
    out = pl.pallas_call(
        kernel_b,
        grid=(B, n_sp),
        in_specs=[
            pl.BlockSpec((None, 1, Cout), lambda b, s: (b, 0, 0)),
            pl.BlockSpec((c.channels, inter), lambda b, s: (0, 0)),
            pl.BlockSpec((1, inter), lambda b, s: (0, 0)),
            pl.BlockSpec((inter, Cout), lambda b, s: (0, 0)),
            pl.BlockSpec((1, Cout), lambda b, s: (0, 0)),
            pl.BlockSpec((None, TS, Cout), lambda b, s: (b, s, 0)),
        ],
        out_specs=pl.BlockSpec((None, TS, c.channels), lambda b, s: (b, s, 0)),
        out_shape=jax.ShapeDtypeStruct((B, M_pad, c.channels), jnp.float32),
        compiler_params=pltpu.CompilerParams(
            dimension_semantics=("parallel", "parallel")),
    )(gap_sum, params["W1"], params["b1"], params["W2"], params["b2"], y)

    out = out[:, :OHW].reshape(B, OH, OW, c.channels)
    return jnp.transpose(out, (0, 3, 1, 2))          # NCHW only at the boundary


# ----------------------------------------------------------------------------
# Deterministic parameter init (PyTorch-layout shapes)
# ----------------------------------------------------------------------------
class ParamGen:
    def __init__(self, seed=0):
        self.key = jax.random.PRNGKey(seed)
        self.count = 0

    def __call__(self, shape):
        k = jax.random.fold_in(self.key, self.count)
        self.count += 1
        fan_in = int(np.prod(shape[1:])) if len(shape) > 1 else int(shape[0])
        return jax.random.normal(k, shape, jnp.float32) / math.sqrt(max(fan_in, 1))


def init_splat_params(pg, cfg: SplAtCfg):
    c = cfg
    Gc = c.groups * c.radix
    inter = c.inter_channels
    return {
        "conv_w": pg((c.channels * c.radix, c.in_channels // Gc,
                      c.kernel_size, c.kernel_size)),
        "fc1_w": pg((inter, c.channels // c.groups, 1, 1)),
        "fc1_b": pg((inter,)),
        "fc2_w": pg((c.channels * c.radix, inter // c.groups, 1, 1)),
        "fc2_b": pg((c.channels * c.radix,)),
    }


# ----------------------------------------------------------------------------
if __name__ == "__main__":
    cfg = SplAtCfg(in_channels=8, channels=8, kernel_size=3, stride=1,
                   padding=1, groups=2, radix=2, reduction_factor=4)
    B, H, W = 2, 16, 16

    pg = ParamGen(seed=0)
    raw_params = init_splat_params(pg, cfg)
    params = prepare_params(raw_params, cfg)   # repacked once, outside the jit

    x = jax.random.normal(jax.random.PRNGKey(0),
                          (B, cfg.in_channels, H, W), jnp.float32)

    out = splat_conv2d_forward(params, x, cfg)
    jax.block_until_ready(out)

    OH = (H + 2 * cfg.padding - cfg.kernel_size) // cfg.stride + 1
    OW = (W + 2 * cfg.padding - cfg.kernel_size) // cfg.stride + 1
    assert out.shape == (B, cfg.channels, OH, OW), out.shape
    assert bool(jnp.all(jnp.isfinite(out)))
    print("KERNEL_OK")
</pallas_src>

<mosaic_0001>
module attributes {stable_mosaic.version = 11 : i64} {
  func.func @_attn_combine_kernel(%arg0: i32, %arg1: i32, %arg2: memref<1x1x16xf32, #tpu.memory_space<vmem>>, %arg3: memref<8x32xf32, #tpu.memory_space<vmem>>, %arg4: memref<1x32xf32, #tpu.memory_space<vmem>>, %arg5: memref<32x16xf32, #tpu.memory_space<vmem>>, %arg6: memref<1x16xf32, #tpu.memory_space<vmem>>, %arg7: memref<1x256x16xf32, #tpu.memory_space<vmem>>, %arg8: memref<1x256x8xf32, #tpu.memory_space<vmem>>) attributes {dimension_semantics = [#tpu.dimension_semantics<parallel>, #tpu.dimension_semantics<parallel>], iteration_bounds = array<i64: 2, 1>, scalar_prefetch = 0 : i64, scratch_operands = 0 : i64, tpu.core_type = #tpu.core_type<tc>, window_params = [{transform_indices = @transform_0, window_bounds = array<i64: 1, 1, 16>}, {pipeline_mode = #tpu.pipeline_mode<synchronous>, transform_indices = @transform_1, window_bounds = array<i64: 8, 32>}, {pipeline_mode = #tpu.pipeline_mode<synchronous>, transform_indices = @transform_2, window_bounds = array<i64: 1, 32>}, {pipeline_mode = #tpu.pipeline_mode<synchronous>, transform_indices = @transform_3, window_bounds = array<i64: 32, 16>}, {pipeline_mode = #tpu.pipeline_mode<synchronous>, transform_indices = @transform_4, window_bounds = array<i64: 1, 16>}, {transform_indices = @transform_5, window_bounds = array<i64: 1, 256, 16>}, {transform_indices = @transform_6, window_bounds = array<i64: 1, 256, 8>}]} {
    %c0 = arith.constant 0 : index
    %c0_0 = arith.constant 0 : index
    %c0_1 = arith.constant 0 : index
    %0 = vector.load %arg2[%c0, %c0_0, %c0_1] : memref<1x1x16xf32, #tpu.memory_space<vmem>>, vector<1x1x16xf32>
    %1 = vector.shape_cast %0 : vector<1x1x16xf32> to vector<1x16xf32>
    %2 = vector.extract_strided_slice %1 {offsets = [0, 0], sizes = [1, 8], strides = [1, 1]} : vector<1x16xf32> to vector<1x8xf32>
    %3 = vector.extract_strided_slice %1 {offsets = [0, 8], sizes = [1, 8], strides = [1, 1]} : vector<1x16xf32> to vector<1x8xf32>
    %4 = arith.addf %2, %3 : vector<1x8xf32>
    %cst = arith.constant 3.906250e-03 : f32
    %5 = vector.broadcast %cst : f32 to vector<1x8xf32>
    %6 = arith.mulf %4, %5 : vector<1x8xf32>
    %c0_2 = arith.constant 0 : index
    %c0_3 = arith.constant 0 : index
    %7 = vector.load %arg3[%c0_2, %c0_3] : memref<8x32xf32, #tpu.memory_space<vmem>>, vector<8x32xf32>
    %cst_4 = arith.constant dense<0.000000e+00> : vector<1x32xf32>
    %8 = tpu.matmul %6, %7, %cst_4 {dimension_numbers = #tpu.dot_dimension_numbers<[1], [0], [0], [1], [0, 0, 1, 1], [], []>} : vector<1x8xf32>, vector<8x32xf32>, vector<1x32xf32> -> vector<1x32xf32>
    %c0_5 = arith.constant 0 : index
    %c0_6 = arith.constant 0 : index
    %9 = vector.load %arg4[%c0_5, %c0_6] : memref<1x32xf32, #tpu.memory_space<vmem>>, vector<1x32xf32>
    %10 = arith.addf %8, %9 : vector<1x32xf32>
    %cst_7 = arith.constant 0.000000e+00 : f32
    %11 = vector.broadcast %cst_7 : f32 to vector<1x32xf32>
    %12 = arith.maximumf %10, %11 : vector<1x32xf32>
    %c0_8 = arith.constant 0 : index
    %c0_9 = arith.constant 0 : index
    %13 = vector.load %arg5[%c0_8, %c0_9] : memref<32x16xf32, #tpu.memory_space<vmem>>, vector<32x16xf32>
    %cst_10 = arith.constant dense<0.000000e+00> : vector<1x16xf32>
    %14 = tpu.matmul %12, %13, %cst_10 {dimension_numbers = #tpu.dot_dimension_numbers<[1], [0], [0], [1], [0, 0, 1, 1], [], []>} : vector<1x32xf32>, vector<32x16xf32>, vector<1x16xf32> -> vector<1x16xf32>
    %c0_11 = arith.constant 0 : index
    %c0_12 = arith.constant 0 : index
    %15 = vector.load %arg6[%c0_11, %c0_12] : memref<1x16xf32, #tpu.memory_space<vmem>>, vector<1x16xf32>
    %16 = arith.addf %14, %15 : vector<1x16xf32>
    %17 = vector.extract_strided_slice %16 {offsets = [0, 0], sizes = [1, 8], strides = [1, 1]} : vector<1x16xf32> to vector<1x8xf32>
    %18 = vector.extract_strided_slice %16 {offsets = [0, 8], sizes = [1, 8], strides = [1, 1]} : vector<1x16xf32> to vector<1x8xf32>
    %19 = arith.subf %18, %17 : vector<1x8xf32>
    %20 = math.exp %19 : vector<1x8xf32>
    %cst_13 = arith.constant 1.000000e+00 : f32
    %21 = vector.broadcast %cst_13 : f32 to vector<1x8xf32>
    %22 = arith.addf %21, %20 : vector<1x8xf32>
    %cst_14 = arith.constant 1.000000e+00 : f32
    %23 = vector.broadcast %cst_14 : f32 to vector<1x8xf32>
    %24 = arith.divf %23, %22 : vector<1x8xf32>
    %c0_15 = arith.constant 0 : index
    %c0_16 = arith.constant 0 : index
    %c0_17 = arith.constant 0 : index
    %25 = vector.load %arg7[%c0_15, %c0_16, %c0_17] : memref<1x256x16xf32, #tpu.memory_space<vmem>>, vector<1x256x16xf32>
    %26 = vector.shape_cast %25 : vector<1x256x16xf32> to vector<256x16xf32>
    %27 = vector.extract_strided_slice %26 {offsets = [0, 0], sizes = [256, 8], strides = [1, 1]} : vector<256x16xf32> to vector<256x8xf32>
    %28 = vector.broadcast %24 : vector<1x8xf32> to vector<256x8xf32>
    %29 = arith.mulf %28, %27 : vector<256x8xf32>
    %cst_18 = arith.constant 1.000000e+00 : f32
    %30 = vector.broadcast %cst_18 : f32 to vector<1x8xf32>
    %31 = arith.subf %30, %24 : vector<1x8xf32>
    %32 = vector.extract_strided_slice %26 {offsets = [0, 8], sizes = [256, 8], strides = [1, 1]} : vector<256x16xf32> to vector<256x8xf32>
    %33 = vector.broadcast %31 : vector<1x8xf32> to vector<256x8xf32>
    %34 = arith.mulf %33, %32 : vector<256x8xf32>
    %35 = arith.addf %29, %34 : vector<256x8xf32>
    %c0_19 = arith.constant 0 : index
    %c0_20 = arith.constant 0 : index
    %c0_21 = arith.constant 0 : index
    %36 = vector.load %arg8[%c0_19, %c0_20, %c0_21] : memref<1x256x8xf32, #tpu.memory_space<vmem>>, vector<1x256x8xf32>
    %37 = vector.shape_cast %36 : vector<1x256x8xf32> to vector<256x8xf32>
    %38 = vector.shape_cast %35 : vector<256x8xf32> to vector<1x256x8xf32>
    tpu.vector_store %arg8[%c0_19, %c0_20, %c0_21], %38 {strides = array<i32>} : memref<1x256x8xf32, #tpu.memory_space<vmem>>, vector<1x256x8xf32>,
    return
  }
  func.func @transform_0(%arg0: i32, %arg1: i32) -> (i32, i32, i32) {
    %c0_i32 = arith.constant 0 : i32
    %c0_i32_0 = arith.constant 0 : i32
    %c0_i32_1 = arith.constant 0 : i32
    return %arg0, %c0_i32, %c0_i32_0 : i32, i32, i32
  }
  func.func @transform_1(%arg0: i32, %arg1: i32) -> (i32, i32) {
    %c0_i32 = arith.constant 0 : i32
    %c0_i32_0 = arith.constant 0 : i32
    %c0_i32_1 = arith.constant 0 : i32
    return %c0_i32, %c0_i32_0 : i32, i32
  }
  func.func @transform_2(%arg0: i32, %arg1: i32) -> (i32, i32) {
    %c0_i32 = arith.constant 0 : i32
    %c0_i32_0 = arith.constant 0 : i32
    %c0_i32_1 = arith.constant 0 : i32
    return %c0_i32, %c0_i32_0 : i32, i32
  }
  func.func @transform_3(%arg0: i32, %arg1: i32) -> (i32, i32) {
    %c0_i32 = arith.constant 0 : i32
    %c0_i32_0 = arith.constant 0 : i32
    %c0_i32_1 = arith.constant 0 : i32
    return %c0_i32, %c0_i32_0 : i32, i32
  }
  func.func @transform_4(%arg0: i32, %arg1: i32) -> (i32, i32) {
    %c0_i32 = arith.constant 0 : i32
    %c0_i32_0 = arith.constant 0 : i32
    %c0_i32_1 = arith.constant 0 : i32
    return %c0_i32, %c0_i32_0 : i32, i32
  }
  func.func @transform_5(%arg0: i32, %arg1: i32) -> (i32, i32, i32) {
    %c0_i32 = arith.constant 0 : i32
    %c0_i32_0 = arith.constant 0 : i32
    return %arg0, %arg1, %c0_i32 : i32, i32, i32
  }
  func.func @transform_6(%arg0: i32, %arg1: i32) -> (i32, i32, i32) {
    %c0_i32 = arith.constant 0 : i32
    %c0_i32_0 = arith.constant 0 : i32
    return %arg0, %arg1, %c0_i32 : i32, i32, i32
  }
}

module attributes {stable_mosaic.version = 11 : i64} {
  func.func @_conv_relu_pool_kernel(%arg0: i32, %arg1: i32, %arg2: i32, %arg3: memref<1x256x128xbf16, #tpu.memory_space<vmem>>, %arg4: memref<128x16xbf16, #tpu.memory_space<vmem>>, %arg5: memref<1x256x16xf32, #tpu.memory_space<vmem>>, %arg6: memref<1x1x16xf32, #tpu.memory_space<vmem>>) attributes {dimension_semantics = [#tpu.dimension_semantics<parallel>, #tpu.dimension_semantics<arbitrary>, #tpu.dimension_semantics<arbitrary>], iteration_bounds = array<i64: 2, 1, 1>, scalar_prefetch = 0 : i64, scratch_operands = 0 : i64, tpu.core_type = #tpu.core_type<tc>, window_params = [{transform_indices = @transform_0, window_bounds = array<i64: 1, 256, 128>}, {transform_indices = @transform_1, window_bounds = array<i64: 128, 16>}, {transform_indices = @transform_2, window_bounds = array<i64: 1, 256, 16>}, {transform_indices = @transform_3, window_bounds = array<i64: 1, 1, 16>}]} {
    %c0_i32 = arith.constant 0 : i32
    %0 = arith.cmpi eq, %arg1, %c0_i32 : i32
    %c0_i32_0 = arith.constant 0 : i32
    %1 = arith.cmpi eq, %arg2, %c0_i32_0 : i32
    %2 = arith.andi %0, %1 : i1
    %3 = arith.extui %2 : i1 to i32
    %c0_i32_1 = arith.constant 0 : i32
    %4 = arith.cmpi ne, %3, %c0_i32_1 : i32
    scf.if %4 {
      %cst_16 = arith.constant 0.000000e+00 : f32
      %21 = vector.broadcast %cst_16 : f32 to vector<1x16xf32>
      %c0_17 = arith.constant 0 : index
      %c0_18 = arith.constant 0 : index
      %c0_19 = arith.constant 0 : index
      %22 = vector.load %arg6[%c0_17, %c0_18, %c0_19] : memref<1x1x16xf32, #tpu.memory_space<vmem>>, vector<1x1x16xf32>
      %23 = vector.shape_cast %22 : vector<1x1x16xf32> to vector<1x16xf32>
      %24 = vector.shape_cast %21 : vector<1x16xf32> to vector<1x1x16xf32>
      tpu.vector_store %arg6[%c0_17, %c0_18, %c0_19], %24 {strides = array<i32>} : memref<1x1x16xf32, #tpu.memory_space<vmem>>, vector<1x1x16xf32>,
    } else {
    }
    %c0_i32_2 = arith.constant 0 : i32
    %5 = arith.cmpi eq, %arg2, %c0_i32_2 : i32
    %6 = arith.extui %5 : i1 to i32
    %c0_i32_3 = arith.constant 0 : i32
    %7 = arith.cmpi ne, %6, %c0_i32_3 : i32
    scf.if %7 {
      %cst_16 = arith.constant 0.000000e+00 : f32
      %21 = vector.broadcast %cst_16 : f32 to vector<256x16xf32>
      %c0_17 = arith.constant 0 : index
      %c0_18 = arith.constant 0 : index
      %c0_19 = arith.constant 0 : index
      %22 = vector.load %arg5[%c0_17, %c0_18, %c0_19] : memref<1x256x16xf32, #tpu.memory_space<vmem>>, vector<1x256x16xf32>
      %23 = vector.shape_cast %22 : vector<1x256x16xf32> to vector<256x16xf32>
      %24 = vector.shape_cast %21 : vector<256x16xf32> to vector<1x256x16xf32>
      tpu.vector_store %arg5[%c0_17, %c0_18, %c0_19], %24 {strides = array<i32>} : memref<1x256x16xf32, #tpu.memory_space<vmem>>, vector<1x256x16xf32>,
    } else {
    }
    %c0 = arith.constant 0 : index
    %c0_4 = arith.constant 0 : index
    %c0_5 = arith.constant 0 : index
    %8 = vector.load %arg5[%c0, %c0_4, %c0_5] : memref<1x256x16xf32, #tpu.memory_space<vmem>>, vector<1x256x16xf32>
    %9 = vector.shape_cast %8 : vector<1x256x16xf32> to vector<256x16xf32>
    %c0_6 = arith.constant 0 : index
    %c0_7 = arith.constant 0 : index
    %c0_8 = arith.constant 0 : index
    %10 = vector.load %arg3[%c0_6, %c0_7, %c0_8] : memref<1x256x128xbf16, #tpu.memory_space<vmem>>, vector<1x256x128xbf16>
    %11 = vector.shape_cast %10 : vector<1x256x128xbf16> to vector<256x128xbf16>
    %c0_9 = arith.constant 0 : index
    %c0_10 = arith.constant 0 : index
    %12 = vector.load %arg4[%c0_9, %c0_10] : memref<128x16xbf16, #tpu.memory_space<vmem>>, vector<128x16xbf16>
    %cst = arith.constant dense<0.000000e+00> : vector<256x16xf32>
    %13 = tpu.matmul %11, %12, %cst {dimension_numbers = #tpu.dot_dimension_numbers<[1], [0], [0], [1], [0, 0, 1, 1], [], []>} : vector<256x128xbf16>, vector<128x16xbf16>, vector<256x16xf32> -> vector<256x16xf32>
    %14 = arith.addf %9, %13 : vector<256x16xf32>
    %c0_11 = arith.constant 0 : index
    %c0_12 = arith.constant 0 : index
    %c0_13 = arith.constant 0 : index
    %15 = vector.load %arg5[%c0_11, %c0_12, %c0_13] : memref<1x256x16xf32, #tpu.memory_space<vmem>>, vector<1x256x16xf32>
    %16 = vector.shape_cast %15 : vector<1x256x16xf32> to vector<256x16xf32>
    %17 = vector.shape_cast %14 : vector<256x16xf32> to vector<1x256x16xf32>
    tpu.vector_store %arg5[%c0_11, %c0_12, %c0_13], %17 {strides = array<i32>} : memref<1x256x16xf32, #tpu.memory_space<vmem>>, vector<1x256x16xf32>,
    %c0_i32_14 = arith.constant 0 : i32
    %18 = arith.cmpi eq, %arg2, %c0_i32_14 : i32
    %19 = arith.extui %18 : i1 to i32
    %c0_i32_15 = arith.constant 0 : i32
    %20 = arith.cmpi ne, %19, %c0_i32_15 : i32
    scf.if %20 {
      %c0_16 = arith.constant 0 : index
      %c0_17 = arith.constant 0 : index
      %c0_18 = arith.constant 0 : index
      %21 = vector.load %arg5[%c0_16, %c0_17, %c0_18] : memref<1x256x16xf32, #tpu.memory_space<vmem>>, vector<1x256x16xf32>
      %22 = vector.shape_cast %21 : vector<1x256x16xf32> to vector<256x16xf32>
      %cst_19 = arith.constant 0.000000e+00 : f32
      %23 = vector.broadcast %cst_19 : f32 to vector<256x16xf32>
      %24 = arith.maximumf %22, %23 : vector<256x16xf32>
      %c0_20 = arith.constant 0 : index
      %c0_21 = arith.constant 0 : index
      %c0_22 = arith.constant 0 : index
      %25 = vector.load %arg5[%c0_20, %c0_21, %c0_22] : memref<1x256x16xf32, #tpu.memory_space<vmem>>, vector<1x256x16xf32>
      %26 = vector.shape_cast %25 : vector<1x256x16xf32> to vector<256x16xf32>
      %27 = vector.shape_cast %24 : vector<256x16xf32> to vector<1x256x16xf32>
      tpu.vector_store %arg5[%c0_20, %c0_21, %c0_22], %27 {strides = array<i32>} : memref<1x256x16xf32, #tpu.memory_space<vmem>>, vector<1x256x16xf32>,
      %c0_23 = arith.constant 0 : index
      %c0_24 = arith.constant 0 : index
      %c0_25 = arith.constant 0 : index
      %28 = vector.load %arg6[%c0_23, %c0_24, %c0_25] : memref<1x1x16xf32, #tpu.memory_space<vmem>>, vector<1x1x16xf32>
      %29 = vector.shape_cast %28 : vector<1x1x16xf32> to vector<1x16xf32>
      %cst_26 = arith.constant dense<0.000000e+00> : vector<16xf32>
      %30 = vector.multi_reduction <add>, %24, %cst_26 [0] : vector<256x16xf32> to vector<16xf32>
      %31 = vector.shape_cast %30 : vector<16xf32> to vector<1x16xf32>
      %32 = arith.addf %29, %31 : vector<1x16xf32>
      %c0_27 = arith.constant 0 : index
      %c0_28 = arith.constant 0 : index
      %c0_29 = arith.constant 0 : index
      %33 = vector.load %arg6[%c0_27, %c0_28, %c0_29] : memref<1x1x16xf32, #tpu.memory_space<vmem>>, vector<1x1x16xf32>
      %34 = vector.shape_cast %33 : vector<1x1x16xf32> to vector<1x16xf32>
      %35 = vector.shape_cast %32 : vector<1x16xf32> to vector<1x1x16xf32>
      tpu.vector_store %arg6[%c0_27, %c0_28, %c0_29], %35 {strides = array<i32>} : memref<1x1x16xf32, #tpu.memory_space<vmem>>, vector<1x1x16xf32>,
    } else {
    }
    return
  }
  func.func @transform_0(%arg0: i32, %arg1: i32, %arg2: i32) -> (i32, i32, i32) {
    %c0_i32 = arith.constant 0 : i32
    return %arg0, %arg1, %arg2 : i32, i32, i32
  }
  func.func @transform_1(%arg0: i32, %arg1: i32, %arg2: i32) -> (i32, i32) {
    %c0_i32 = arith.constant 0 : i32
    %c0_i32_0 = arith.constant 0 : i32
    return %arg2, %c0_i32 : i32, i32
  }
  func.func @transform_2(%arg0: i32, %arg1: i32, %arg2: i32) -> (i32, i32, i32) {
    %c0_i32 = arith.constant 0 : i32
    %c0_i32_0 = arith.constant 0 : i32
    return %arg0, %arg1, %c0_i32 : i32, i32, i32
  }
  func.func @transform_3(%arg0: i32, %arg1: i32, %arg2: i32) -> (i32, i32, i32) {
    %c0_i32 = arith.constant 0 : i32
    %c0_i32_0 = arith.constant 0 : i32
    %c0_i32_1 = arith.constant 0 : i32
    return %arg0, %c0_i32, %c0_i32_0 : i32, i32, i32
  }
}

</mosaic_0001>

<bundles_post_ra>
// kernel: splat_conv2d_forward.3
= control target key start
LH: loop header
LB: loop body
LE: loop exit
PB: predicated region body
PF: predicated region fallthrough
CT: control target
= control target key end

     0   :  { %s1132_s21 = smov 0   ;;  %s1134_s22 = smov 0   ;;  %s1569_s0 = inlined_call_operand.vmem [shape: f32[2,1,16], index: 0, kind: input, shape index: {}]   ;;  %s1570_s1 = inlined_call_operand.vmem [shape: f32[8,32], index: 1, kind: input, shape index: {}]   ;;  %s1571_s2 = inlined_call_operand.vmem [shape: f32[1,32], index: 2, kind: input, shape index: {}]   ;;  %s1572_s3 = inlined_call_operand.vmem [shape: f32[32,16], index: 3, kind: input, shape index: {}]   ;;  %s1573_s4 = inlined_call_operand.vmem [shape: f32[1,16], index: 4, kind: input, shape index: {}]   ;;  %s1574_s5 = inlined_call_operand.vmem [shape: f32[2,256,16], index: 5, kind: input, shape index: {}]   ;;  %s1575_s6 = inlined_call_operand.vmem [shape: f32[2,256,8], index: 6, kind: output, shape index: {}]  }
   0x1   :  { %s1136_s23 = smov 0  }
   0x2 LB: > { %s28_s24 = sadd.s32 1, %s1087_s22  ;;  %p1003_p0 = scmp.ge.s32.totalorder %s1091_s23, 1  ;;  %s1091_s23 = sphi %s1136_s23, %s16_s23   ;;  %s1087_s22 = sphi %s1134_s22, %s1577_s22   ;;  %s1083_s21 = sphi %s1132_s21, %s1576_s21  }
   0x3   : > { %p30_p1 = scmp.ge.s32.totalorder %s28_s24, 2  ;;  %p241_p2 = scmp.lt.s32.totalorder %s1091_s23, 3 }
   0x5   : > { %s1579_s24 = smov (%p30_p1, %s28_s24), 0  ;;  %p242_p3 = pnand %p1003_p0, %p241_p2 }
   0x6   : > { %p282_p4 = scmp.lt.s32.totalorder (!%p242_p3), %s1083_s21, 1  ;;  %s1095_s8 = smov (!%p242_p3), 120  }
   0x7   : > { %245 = sbr.rel (%p242_p3) target bundleno = 860 (0x35c), region = 44  ;;  %s1096_s19 = smov (!%p242_p3), 8  }
   0xc   : > { %v312_v0 = vld [vmem:[%s1570_s1] sm:$0xff]  ;;  %v1093_v1 = vmov 0.0   ;;  %vm1094_vm0 = vmmov 0   ;;  %v392_v2 = vld [vmem:[%s1572_s3 + $0x18] sm:$0xff]  ;;  %s1581_s21 = smov (!%p282_p4, %s1083_s21), 1  ;;  %vm314_vm1 = vcmask 64512  }
   0xd   : > { %1021 = vmatprep.subr.mxu0 %v1093_v1  ;;  %1023 = vmatprep.mubr.msk.f32.mxu0 %vm1094_vm0, %v1093_v1  ;;  %s284_s7 = scalar_lea.vmem %s1569_s0, %s1581_s21  ;;  %s1012_s9 = sshll.u32 %s1581_s21, 8  ;;  %v391_v7 = vld [vmem:[%s1572_s3 + $0x10] sm:$0xff]  ;;  %v390_v8 = vld [vmem:[%s1572_s3 + $0x8] sm:$0xff]  ;;  %v389_v9 = vld [vmem:[%s1572_s3] sm:$0xff]  ;;  %vm394_vm2 = vcmask 261120  }
   0xe   : > { %1022 = vmatpush3.msra.mxu0 %v312_v0  ;;  %1026 = vmatprep.subr.mxu1 %v1093_v1  ;;  %v305_v3 = vld [vmem:[%s284_s7] sm:$0x1]  ;;  %s1176_s16 = scalar_lea.vmem %s1574_s5, %s1012_s9  ;;  %s1494_s30 = scalar_lea.vmem %s1575_s6, %s1012_s9 }
   0xf   : > { %1027 = vmatpush3.msra.mxu1 %v392_v2  ;;  %1034 = vmatprep.mubr.msk.f32.mxu1 %vm1094_vm0, %v1093_v1  ;;  %v1182_v10 = vld [vmem:[%s1176_s16] sm:$0xff]  ;;  %v1185_v11 = vld [vmem:[%s1176_s16 + $0x10] sm:$0xff]  ;;  %v1192_v12 = vld [vmem:[%s1176_s16 + $0x8] sm:$0xff]  ;;  %v510_v2 = vlaneseq }
  0x10   : > { %1028 = vmatprep.subr.mxu1 %v1093_v1  ;;  %307 = vrot.lane.b32.xlu0 %v305_v3, %s1095_s8  ;;  %v1195_v13 = vld [vmem:[%s1176_s16 + $0x20] sm:$0xff]  ;;  %v1202_v14 = vld [vmem:[%s1176_s16 + $0x18] sm:$0xff]  ;;  %v1205_v15 = vld [vmem:[%s1176_s16 + $0x30] sm:$0xff] }
  0x11   : > { %1029 = vmatpush3.msra.mxu1 %v391_v7  ;;  %546 = vrot.lane.b32.xlu1 %v1182_v10, %s1096_s19  ;;  %v1212_v16 = vld [vmem:[%s1176_s16 + $0x28] sm:$0xff]  ;;  %v1215_v17 = vld [vmem:[%s1176_s16 + $0x40] sm:$0xff]  ;;  %v1222_v18 = vld [vmem:[%s1176_s16 + $0x38] sm:$0xff] }
  0x12   : > { %1030 = vmatprep.subr.mxu1 %v1093_v1  ;;  %v1225_v19 = vld [vmem:[%s1176_s16 + $0x50] sm:$0xff]  ;;  %v1232_v20 = vld [vmem:[%s1176_s16 + $0x48] sm:$0xff]  ;;  %v1235_v21 = vld [vmem:[%s1176_s16 + $0x60] sm:$0xff] }
  0x13   : > { %1031 = vmatpush3.msra.mxu1 %v390_v8  ;;  %v1242_v22 = vld [vmem:[%s1176_s16 + $0x58] sm:$0xff]  ;;  %v313_v23 = vld [vmem:[%s1571_s2] sm:$0x1]  ;;  %v1250_v28 = vld [vmem:[%s1176_s16 + $0x68] sm:$0xff] }
  0x14   : > { %1032 = vmatprep.subr.mxu1 %v1093_v1  ;;  %550 = vrot.lane.b32.xlu0 %v1185_v11, %s1096_s19  ;;  %v1255_v29 = vld [vmem:[%s1176_s16 + $0x78] sm:$0xff]  ;;  %v1260_v30 = vld [vmem:[%s1176_s16 + $0x88] sm:$0xff]  ;;  %v393_v38 = vld [vmem:[%s1573_s4] sm:$0x1] }
  0x15   : > { %1033 = vmatpush3.msra.mxu1 %v389_v9  ;;  %548 = vrot.lane.b32.xlu1 %v1192_v12, %s1096_s19  ;;  %v1265_v31 = vld [vmem:[%s1176_s16 + $0x98] sm:$0xff]  ;;  %v1270_v32 = vld [vmem:[%s1176_s16 + $0xa8] sm:$0xff]  ;;  %v1304_v42 = vld [vmem:[%s1176_s16 + $0x70] sm:$0xff] }
  0x16   : > { %v1275_v33 = vld [vmem:[%s1176_s16 + $0xb8] sm:$0xff]  ;;  %v1280_v34 = vld [vmem:[%s1176_s16 + $0xc8] sm:$0xff]  ;;  %v1309_v43 = vld [vmem:[%s1176_s16 + $0x80] sm:$0xff] }
  0x17   : > { %v1285_v35 = vld [vmem:[%s1176_s16 + $0xd8] sm:$0xff]  ;;  %v1290_v36 = vld [vmem:[%s1176_s16 + $0xe8] sm:$0xff]  ;;  %v1314_v44 = vld [vmem:[%s1176_s16 + $0x90] sm:$0xff] }
  0x18   : > { %554 = vrot.lane.b32.xlu0 %v1195_v13, %s1096_s19  ;;  %v1295_v37 = vld [vmem:[%s1176_s16 + $0xf8] sm:$0xff]  ;;  %v1319_v45 = vld [vmem:[%s1176_s16 + $0xa0] sm:$0xff]  ;;  %v1324_v46 = vld [vmem:[%s1176_s16 + $0xb0] sm:$0xff] }
  0x19   : > { %552 = vrot.lane.b32.xlu1 %v1202_v14, %s1096_s19  ;;  %v1329_v47 = vld [vmem:[%s1176_s16 + $0xc0] sm:$0xff]  ;;  %v1334_v48 = vld [vmem:[%s1176_s16 + $0xd0] sm:$0xff] }
  0x1a   : > { %v1339_v49 = vld [vmem:[%s1176_s16 + $0xe0] sm:$0xff]  ;;  %v1344_v50 = vld [vmem:[%s1176_s16 + $0xf0] sm:$0xff] }
  0x1c   : > { %558 = vrot.lane.b32.xlu0 %v1205_v15, %s1096_s19 }
  0x1d   : > { %556 = vrot.lane.b32.xlu1 %v1212_v16, %s1096_s19 }
  0x20   : > { %562 = vrot.lane.b32.xlu0 %v1215_v17, %s1096_s19 }
  0x21   : > { %560 = vrot.lane.b32.xlu1 %v1222_v18, %s1096_s19 }
  0x24   : > { %566 = vrot.lane.b32.xlu0 %v1225_v19, %s1096_s19 }
  0x25   : > { %564 = vrot.lane.b32.xlu1 %v1232_v20, %s1096_s19 }
  0x28   : > { %570 = vrot.lane.b32.xlu0 %v1235_v21, %s1096_s19 }
  0x29   : > { %568 = vrot.lane.b32.xlu1 %v1242_v22, %s1096_s19 }
  0x2d   : > { %572 = vrot.lane.b32.xlu1 %v1250_v28, %s1096_s19 }
  0x31   : > { %576 = vrot.lane.b32.xlu1 %v1255_v29, %s1096_s19 }
  0x35   : > { %580 = vrot.lane.b32.xlu1 %v1260_v30, %s1096_s19 }
  0x39   : > { %584 = vrot.lane.b32.xlu1 %v1265_v31, %s1096_s19 }
  0x3d   : > { %588 = vrot.lane.b32.xlu1 %v1270_v32, %s1096_s19 }
  0x41   : > { %592 = vrot.lane.b32.xlu1 %v1275_v33, %s1096_s19 }
  0x45   : > { %596 = vrot.lane.b32.xlu1 %v1280_v34, %s1096_s19 }
  0x49   : > { %600 = vrot.lane.b32.xlu1 %v1285_v35, %s1096_s19 }
  0x4d   : > { %604 = vrot.lane.b32.xlu1 %v1290_v36, %s1096_s19 }
  0x51   : > { %608 = vrot.lane.b32.xlu1 %v1295_v37, %s1096_s19 }
  0x82   : > { %v308_v4 = vpop.permute.xlu0 %307 }
  0x83   : > { %v310_v5 = vadd.f32 %v308_v4, %v305_v3  ;;  %v547_v60 = vpop.permute.xlu1 %546 }
  0x85   : > { %v311_v6 = vmul.f32 0.00390625, %v310_v5  ;;  %v511_v5 = vshrl.u32 %v510_v2, 7 }
  0x86   : > { %v551_v51 = vpop.permute.xlu0 %550 }
  0x87   : > { %1024 = vmatmul.mubr.msk.f32.vlgmr.msra.gmra.mxu0 %vm314_vm1, %v311_v6  ;;  %v549_v61 = vpop.permute.xlu1 %548  ;;  %v512_v8 = vsub.s32 0, %v511_v5 }
  0x8a   : > { %v555_v52 = vpop.permute.xlu0 %554 }
  0x8b   : > { %v553_v0 = vpop.permute.xlu1 %552 }
  0x8e   : > { %v559_v53 = vpop.permute.xlu0 %558 }
  0x8f   : > { %v557_v1 = vpop.permute.xlu1 %556 }
  0x92   : > { %v1348_v54 = vpop.permute.xlu0 %562 }
  0x93   : > { %v561_v3 = vpop.permute.xlu1 %560 }
  0x96   : > { %v1350_v55 = vpop.permute.xlu0 %566 }
  0x97   : > { %v565_v7 = vpop.permute.xlu1 %564 }
  0x9a   : > { %v1352_v56 = vpop.permute.xlu0 %570 }
 0x147   : > { %v384_v24 = vpop.f32.mrf.mxu0 }
 0x148   : > { %v385_v25 = vadd.f32 %v384_v24, %v313_v23  ;;  %v569_v24 = vpop.permute.xlu1 %568 }
 0x149   : > { %v1025_v26 = vpop.f32.mrf.mxu0 }
 0x14a   : > { %v388_v27 = vmax.f32 %v385_v25, 0.0 }
 0x14c   : > { %1035 = vmatmul.mubr.msk.f32.vlgmr.msra.gmra.mxu1 %vm394_vm2, %v388_v27 }
 0x20c   : > { %v464_v39 = vpop.f32.mrf.mxu1 }
 0x20d   : > { %v465_v40 = vadd.f32 %v464_v39, %v393_v38 }
 0x20e   : > { %v1036_v41 = vpop.f32.mrf.mxu1 }
 0x20f   : > { %469 = vrot.lane.b32.xlu0 %v465_v40, %s1096_s19 }
 0x213   : > { %574 = vrot.lane.b32.xlu0 %v1304_v42, %s1096_s19 }
 0x217   : > { %578 = vrot.lane.b32.xlu0 %v1309_v43, %s1096_s19 }
 0x21b   : > { %582 = vrot.lane.b32.xlu0 %v1314_v44, %s1096_s19 }
 0x21f   : > { %586 = vrot.lane.b32.xlu0 %v1319_v45, %s1096_s19 }
 0x223   : > { %590 = vrot.lane.b32.xlu0 %v1324_v46, %s1096_s19 }
 0x227   : > { %594 = vrot.lane.b32.xlu0 %v1329_v47, %s1096_s19 }
 0x22b   : > { %598 = vrot.lane.b32.xlu0 %v1334_v48, %s1096_s19 }
 0x22f   : > { %602 = vrot.lane.b32.xlu0 %v1339_v49, %s1096_s19 }
 0x233   : > { %606 = vrot.lane.b32.xlu0 %v1344_v50, %s1096_s19 }
 0x281   : > { %v470_v57 = vpop.permute.xlu0 %469 }
 0x282   : > { %v472_v58 = vsub.f32 %v465_v40, %v470_v57  ;;  %v573_v57 = vpop.permute.xlu1 %572 }
 0x284   : > { %v473_v59 = vmul.f32 1.442695, %v472_v58 }
 0x285   : > { %v575_v2 = vpop.permute.xlu0 %574 }
 0x286   : > { %1065 = vpow2.f32 %v473_v59 }
 0x293   : > { %v1066_v62 = vpop.eup %1065 }
 0x294   : > { %v475_v63 = vadd.f32 1.0, %v1066_v62 }
 0x296   : > { %1067 = vrcp.f32 %v475_v63  ;;  %v577_v63 = vpop.permute.xlu1 %576 }
 0x2a3   : > { %v1068_v4 = vpop.eup %1067 }
 0x2a4   : > { %v674_v6 = vsub.f32 1.0, %v1068_v4  ;;  %v1356_v23 = vrot.slane %v1068_v4, %v512_v8 }
 0x2a6   : > { %v1354_v9 = vrot.slane %v674_v6, %v512_v8  ;;  %v642_v27 = vmul.f32 %v547_v60, %v1356_v23  ;;  %v643_v38 = vmul.f32 %v549_v61, %v1356_v23  ;;  %v645_v59 = vmul.f32 %v553_v0, %v1356_v23  ;;  %v581_v8 = vpop.permute.xlu1 %580 }
 0x2a7   : > { %v647_v62 = vmul.f32 %v557_v1, %v1356_v23  ;;  %v648_v1 = vmul.f32 %v559_v53, %v1356_v23 }
 0x2a8   : > { %v679_v25 = vmul.f32 %v1354_v9, %v1182_v10  ;;  %v680_v26 = vmul.f32 %v1354_v9, %v1192_v12  ;;  %v682_v39 = vmul.f32 %v1354_v9, %v1202_v14  ;;  %v681_v58 = vmul.f32 %v1354_v9, %v1185_v11 }
 0x2a9   : > { %v644_v10 = vmul.f32 %v551_v51, %v1356_v23  ;;  %v684_v12 = vmul.f32 %v1354_v9, %v1212_v16  ;;  %v683_v14 = vmul.f32 %v1354_v9, %v1195_v13  ;;  %v646_v11 = vmul.f32 %v555_v52, %v1356_v23 }
 0x2aa   : > { %v711_v40 = vadd.f32 %v679_v25, %v642_v27  ;;  %v712_v41 = vadd.f32 %v680_v26, %v643_v38  ;;  %v714_v60 = vadd.f32 %v682_v39, %v645_v59  ;;  %v686_v51 = vmul.f32 %v1354_v9, %v1222_v18  ;;  %v579_v25 = vpop.permute.xlu0 %578  ;;  %v585_v38 = vpop.permute.xlu1 %584 }
 0x2ab   : > { %v713_v61 = vadd.f32 %v681_v58, %v644_v10  ;;  %v716_v0 = vadd.f32 %v684_v12, %v647_v62  ;;  %v685_v16 = vmul.f32 %v1354_v9, %v1205_v15  ;;  %v715_v4 = vadd.f32 %v683_v14, %v646_v11 }
 0x2ac   : > { %777 = vrot.lane.b32.xlu1 %v712_v41, %s1095_s8  ;;  %775 = vrot.lane.b32.xlu0 %v711_v40, %s1095_s8  ;;  %v649_v13 = vmul.f32 %v561_v3, %v1356_v23  ;;  %v688_v52 = vmul.f32 %v1354_v9, %v1232_v20  ;;  %v687_v18 = vmul.f32 %v1354_v9, %v1215_v17 }
 0x2ad   : > { %v717_v6 = vadd.f32 %v685_v16, %v648_v1  ;;  %v651_v15 = vmul.f32 %v565_v7, %v1356_v23  ;;  %v650_v3 = vmul.f32 %v1348_v54, %v1356_v23  ;;  %v690_v53 = vmul.f32 %v1354_v9, %v1242_v22 }
 0x2ae   : > { %v718_v5 = vadd.f32 %v686_v51, %v649_v13  ;;  %v689_v26 = vmul.f32 %v1354_v9, %v1225_v19  ;;  %v653_v27 = vmul.f32 %v569_v24, %v1356_v23  ;;  %v652_v7 = vmul.f32 %v1350_v55, %v1356_v23  ;;  %v583_v22 = vpop.permute.xlu0 %582  ;;  %v589_v10 = vpop.permute.xlu1 %588 }
 0x2af   : > { %v720_v20 = vadd.f32 %v688_v52, %v651_v15  ;;  %v719_v17 = vadd.f32 %v687_v18, %v650_v3  ;;  %v692_v54 = vmul.f32 %v1354_v9, %v1250_v28  ;;  %v691_v40 = vmul.f32 %v1354_v9, %v1235_v21 }
 0x2b0   : > { %781 = vrot.lane.b32.xlu1 %v714_v60, %s1095_s8  ;;  %779 = vrot.lane.b32.xlu0 %v713_v61, %s1095_s8  ;;  %v722_v39 = vadd.f32 %v690_v53, %v653_v27  ;;  %v721_v19 = vadd.f32 %v689_v26, %v652_v7  ;;  %v655_v41 = vmul.f32 %v573_v57, %v1356_v23 }
 0x2b1   : > { %v654_v24 = vmul.f32 %v1352_v56, %v1356_v23  ;;  %v694_v55 = vmul.f32 %v1354_v9, %v1255_v29  ;;  %v693_v28 = vmul.f32 %v1354_v9, %v1304_v42  ;;  %v657_v21 = vmul.f32 %v577_v63, %v1356_v23 }
 0x2b2   : > { %v724_v58 = vadd.f32 %v692_v54, %v655_v41  ;;  %v587_v12 = vpop.permute.xlu0 %586  ;;  %v656_v57 = vmul.f32 %v575_v2, %v1356_v23  ;;  %v696_v56 = vmul.f32 %v1354_v9, %v1260_v30  ;;  %v695_v29 = vmul.f32 %v1354_v9, %v1309_v43  ;;  %v593_v62 = vpop.permute.xlu1 %592 }
 0x2b3   : > { %v723_v59 = vadd.f32 %v691_v40, %v654_v24  ;;  %v726_v60 = vadd.f32 %v694_v55, %v657_v21  ;;  %v659_v42 = vmul.f32 %v581_v8, %v1356_v23  ;;  %v658_v61 = vmul.f32 %v579_v25, %v1356_v23 }
 0x2b4   : > { %785 = vrot.lane.b32.xlu1 %v716_v0, %s1095_s8  ;;  %783 = vrot.lane.b32.xlu0 %v715_v4, %s1095_s8  ;;  %v725_v14 = vadd.f32 %v693_v28, %v656_v57  ;;  %v698_v11 = vmul.f32 %v1354_v9, %v1265_v31  ;;  %v697_v30 = vmul.f32 %v1354_v9, %v1314_v44 }
 0x2b5   : > { %v728_v63 = vadd.f32 %v696_v56, %v659_v42  ;;  %v727_v0 = vadd.f32 %v695_v29, %v658_v61  ;;  %v661_v43 = vmul.f32 %v585_v38, %v1356_v23  ;;  %v660_v2 = vmul.f32 %v583_v22, %v1356_v23 }
 0x2b6   : > { %v591_v51 = vpop.permute.xlu0 %590  ;;  %v700_v16 = vmul.f32 %v1354_v9, %v1270_v32  ;;  %v699_v31 = vmul.f32 %v1354_v9, %v1319_v45  ;;  %v597_v1 = vpop.permute.xlu1 %596  ;;  %v663_v44 = vmul.f32 %v589_v10, %v1356_v23  ;;  %v702_v18 = vmul.f32 %v1354_v9, %v1275_v33 }
 0x2b7   : > { %v730_v4 = vadd.f32 %v698_v11, %v661_v43  ;;  %v729_v13 = vadd.f32 %v697_v30, %v660_v2  ;;  %v701_v32 = vmul.f32 %v1354_v9, %v1324_v46  ;;  %v665_v45 = vmul.f32 %v593_v62, %v1356_v23 }
 0x2b8   : > { %789 = vrot.lane.b32.xlu1 %v718_v5, %s1095_s8  ;;  %787 = vrot.lane.b32.xlu0 %v717_v6, %s1095_s8  ;;  %v662_v5 = vmul.f32 %v587_v12, %v1356_v23  ;;  %v732_v6 = vadd.f32 %v700_v16, %v663_v44  ;;  %v664_v15 = vmul.f32 %v591_v51, %v1356_v23 }
 0x2b9   : > { %v704_v3 = vmul.f32 %v1354_v9, %v1280_v34  ;;  %v734_v53 = vadd.f32 %v702_v18, %v665_v45  ;;  %v703_v33 = vmul.f32 %v1354_v9, %v1329_v47  ;;  %v667_v46 = vmul.f32 %v597_v1, %v1356_v23 }
 0x2ba   : > { %v595_v52 = vpop.permute.xlu0 %594  ;;  %v731_v8 = vadd.f32 %v699_v31, %v662_v5  ;;  %v601_v25 = vpop.permute.xlu1 %600  ;;  %v733_v26 = vadd.f32 %v701_v32, %v664_v15  ;;  %v706_v27 = vmul.f32 %v1354_v9, %v1285_v35  ;;  %v705_v34 = vmul.f32 %v1354_v9, %v1334_v48 }
 0x2bb   : > { %v736_v7 = vadd.f32 %v704_v3, %v667_v46  ;;  %v669_v47 = vmul.f32 %v601_v25, %v1356_v23  ;;  %v708_v40 = vmul.f32 %v1354_v9, %v1290_v36  ;;  %v707_v35 = vmul.f32 %v1354_v9, %v1339_v49 }
 0x2bc   : > { %793 = vrot.lane.b32.xlu1 %v720_v20, %s1095_s8  ;;  %791 = vrot.lane.b32.xlu0 %v719_v17, %s1095_s8  ;;  %v666_v17 = vmul.f32 %v595_v52, %v1356_v23 }
 0x2be   : > { %v599_v20 = vpop.permute.xlu0 %598  ;;  %v735_v38 = vadd.f32 %v703_v33, %v666_v17  ;;  %v605_v54 = vpop.permute.xlu1 %604 }
 0x2bf   : > { %v668_v22 = vmul.f32 %v599_v20, %v1356_v23  ;;  %v671_v48 = vmul.f32 %v605_v54, %v1356_v23 }
 0x2c0   : > { %797 = vrot.lane.b32.xlu1 %v722_v39, %s1095_s8  ;;  %795 = vrot.lane.b32.xlu0 %v721_v19, %s1095_s8  ;;  %v738_v19 = vadd.f32 %v706_v27, %v669_v47 }
 0x2c1   : > { %v737_v41 = vadd.f32 %v705_v34, %v668_v22  ;;  %v740_v28 = vadd.f32 %v708_v40, %v671_v48 }
 0x2c2   : > { %v603_v39 = vpop.permute.xlu0 %602  ;;  %v609_v55 = vpop.permute.xlu1 %608 }
 0x2c3   : > { %v670_v24 = vmul.f32 %v603_v39, %v1356_v23  ;;  %v673_v10 = vmul.f32 %v609_v55, %v1356_v23 }
 0x2c4   : > { %801 = vrot.lane.b32.xlu1 %v724_v58, %s1095_s8  ;;  %799 = vrot.lane.b32.xlu0 %v723_v59, %s1095_s8  ;;  %v710_v58 = vmul.f32 %v1354_v9, %v1295_v37  ;;  %v709_v59 = vmul.f32 %v1354_v9, %v1344_v50 }
 0x2c5   : > { %v739_v49 = vadd.f32 %v707_v35, %v670_v24 }
 0x2c6   : > { %v607_v36 = vpop.permute.xlu0 %606  ;;  %v742_v12 = vadd.f32 %v710_v58, %v673_v10 }
 0x2c7   : > { %v672_v21 = vmul.f32 %v607_v36, %v1356_v23 }
 0x2c8   : > { %805 = vrot.lane.b32.xlu1 %v726_v60, %s1095_s8  ;;  %803 = vrot.lane.b32.xlu0 %v725_v14, %s1095_s8 }
 0x2c9   : > { %v741_v57 = vadd.f32 %v709_v59, %v672_v21 }
 0x2cc   : > { %809 = vrot.lane.b32.xlu1 %v728_v63, %s1095_s8  ;;  %807 = vrot.lane.b32.xlu0 %v727_v0, %s1095_s8 }
 0x2d0   : > { %813 = vrot.lane.b32.xlu1 %v730_v4, %s1095_s8  ;;  %811 = vrot.lane.b32.xlu0 %v729_v13, %s1095_s8 }
 0x2d4   : > { %817 = vrot.lane.b32.xlu1 %v732_v6, %s1095_s8  ;;  %815 = vrot.lane.b32.xlu0 %v731_v8, %s1095_s8 }
 0x2d8   : > { %821 = vrot.lane.b32.xlu1 %v734_v53, %s1095_s8  ;;  %819 = vrot.lane.b32.xlu0 %v733_v26, %s1095_s8 }
 0x2dc   : > { %825 = vrot.lane.b32.xlu1 %v736_v7, %s1095_s8  ;;  %823 = vrot.lane.b32.xlu0 %v735_v38, %s1095_s8 }
 0x2e0   : > { %829 = vrot.lane.b32.xlu1 %v738_v19, %s1095_s8  ;;  %827 = vrot.lane.b32.xlu0 %v737_v41, %s1095_s8 }
 0x2e4   : > { %833 = vrot.lane.b32.xlu1 %v740_v28, %s1095_s8  ;;  %831 = vrot.lane.b32.xlu0 %v739_v49, %s1095_s8 }
 0x2e8   : > { %837 = vrot.lane.b32.xlu1 %v742_v12, %s1095_s8  ;;  %835 = vrot.lane.b32.xlu0 %v741_v57, %s1095_s8 }
 0x31e   : > { %v778_v37 = vpop.permute.xlu1 %777  ;;  %v776_v50 = vpop.permute.xlu0 %775 }
 0x31f   : > { %872 = vst.msk [vmem:[%s1494_s30 + $0x8] sm:$0xff] %vm314_vm1, %v778_v37  ;;  %871 = vst.msk [vmem:[%s1494_s30] sm:$0xff] %vm314_vm1, %v776_v50 }
 0x322   : > { %v782_v9 = vpop.permute.xlu1 %781  ;;  %v780_v23 = vpop.permute.xlu0 %779 }
 0x323   : > { %874 = vst.msk [vmem:[%s1494_s30 + $0x18] sm:$0xff] %vm314_vm1, %v782_v9  ;;  %873 = vst.msk [vmem:[%s1494_s30 + $0x10] sm:$0xff] %vm314_vm1, %v780_v23 }
 0x326   : > { %v786_v56 = vpop.permute.xlu1 %785  ;;  %v784_v60 = vpop.permute.xlu0 %783 }
 0x327   : > { %876 = vst.msk [vmem:[%s1494_s30 + $0x28] sm:$0xff] %vm314_vm1, %v786_v56  ;;  %875 = vst.msk [vmem:[%s1494_s30 + $0x20] sm:$0xff] %vm314_vm1, %v784_v60 }
 0x32a   : > { %v790_v29 = vpop.permute.xlu1 %789  ;;  %v788_v14 = vpop.permute.xlu0 %787 }
 0x32b   : > { %878 = vst.msk [vmem:[%s1494_s30 + $0x38] sm:$0xff] %vm314_vm1, %v790_v29  ;;  %877 = vst.msk [vmem:[%s1494_s30 + $0x30] sm:$0xff] %vm314_vm1, %v788_v14 }
 0x32e   : > { %v794_v42 = vpop.permute.xlu1 %793  ;;  %v792_v61 = vpop.permute.xlu0 %791 }
 0x32f   : > { %880 = vst.msk [vmem:[%s1494_s30 + $0x48] sm:$0xff] %vm314_vm1, %v794_v42  ;;  %879 = vst.msk [vmem:[%s1494_s30 + $0x40] sm:$0xff] %vm314_vm1, %v792_v61 }
 0x332   : > { %v798_v62 = vpop.permute.xlu1 %797  ;;  %v796_v11 = vpop.permute.xlu0 %795 }
 0x333   : > { %882 = vst.msk [vmem:[%s1494_s30 + $0x58] sm:$0xff] %vm314_vm1, %v798_v62  ;;  %881 = vst.msk [vmem:[%s1494_s30 + $0x50] sm:$0xff] %vm314_vm1, %v796_v11 }
 0x336   : > { %v802_v63 = vpop.permute.xlu1 %801  ;;  %v800_v51 = vpop.permute.xlu0 %799 }
 0x337   : > { %884 = vst.msk [vmem:[%s1494_s30 + $0x68] sm:$0xff] %vm314_vm1, %v802_v63  ;;  %883 = vst.msk [vmem:[%s1494_s30 + $0x60] sm:$0xff] %vm314_vm1, %v800_v51 }
 0x33a   : > { %v806_v30 = vpop.permute.xlu1 %805  ;;  %v804_v0 = vpop.permute.xlu0 %803 }
 0x33b   : > { %886 = vst.msk [vmem:[%s1494_s30 + $0x78] sm:$0xff] %vm314_vm1, %v806_v30  ;;  %885 = vst.msk [vmem:[%s1494_s30 + $0x70] sm:$0xff] %vm314_vm1, %v804_v0 }
 0x33e   : > { %v810_v43 = vpop.permute.xlu1 %809  ;;  %v808_v2 = vpop.permute.xlu0 %807 }
 0x33f   : > { %888 = vst.msk [vmem:[%s1494_s30 + $0x88] sm:$0xff] %vm314_vm1, %v810_v43  ;;  %887 = vst.msk [vmem:[%s1494_s30 + $0x80] sm:$0xff] %vm314_vm1, %v808_v2 }
 0x342   : > { %v814_v16 = vpop.permute.xlu1 %813  ;;  %v812_v4 = vpop.permute.xlu0 %811 }
 0x343   : > { %890 = vst.msk [vmem:[%s1494_s30 + $0x98] sm:$0xff] %vm314_vm1, %v814_v16  ;;  %889 = vst.msk [vmem:[%s1494_s30 + $0x90] sm:$0xff] %vm314_vm1, %v812_v4 }
 0x346   : > { %v818_v31 = vpop.permute.xlu1 %817  ;;  %v816_v13 = vpop.permute.xlu0 %815 }
 0x347   : > { %892 = vst.msk [vmem:[%s1494_s30 + $0xa8] sm:$0xff] %vm314_vm1, %v818_v31  ;;  %891 = vst.msk [vmem:[%s1494_s30 + $0xa0] sm:$0xff] %vm314_vm1, %v816_v13 }
 0x34a   : > { %v822_v1 = vpop.permute.xlu1 %821  ;;  %v820_v44 = vpop.permute.xlu0 %819 }
 0x34b   : > { %894 = vst.msk [vmem:[%s1494_s30 + $0xb8] sm:$0xff] %vm314_vm1, %v822_v1  ;;  %893 = vst.msk [vmem:[%s1494_s30 + $0xb0] sm:$0xff] %vm314_vm1, %v820_v44 }
 0x34e   : > { %v826_v52 = vpop.permute.xlu1 %825  ;;  %v824_v5 = vpop.permute.xlu0 %823 }
 0x34f   : > { %896 = vst.msk [vmem:[%s1494_s30 + $0xc8] sm:$0xff] %vm314_vm1, %v826_v52  ;;  %895 = vst.msk [vmem:[%s1494_s30 + $0xc0] sm:$0xff] %vm314_vm1, %v824_v5 }
 0x352   : > { %v830_v18 = vpop.permute.xlu1 %829  ;;  %v828_v6 = vpop.permute.xlu0 %827 }
 0x353   : > { %898 = vst.msk [vmem:[%s1494_s30 + $0xd8] sm:$0xff] %vm314_vm1, %v830_v18  ;;  %897 = vst.msk [vmem:[%s1494_s30 + $0xd0] sm:$0xff] %vm314_vm1, %v828_v6 }
 0x356   : > { %v834_v32 = vpop.permute.xlu1 %833  ;;  %v832_v8 = vpop.permute.xlu0 %831 }
 0x357   : > { %900 = vst.msk [vmem:[%s1494_s30 + $0xe8] sm:$0xff] %vm314_vm1, %v834_v32  ;;  %899 = vst.msk [vmem:[%s1494_s30 + $0xe0] sm:$0xff] %vm314_vm1, %v832_v8 }
 0x35a   : > { %v838_v45 = vpop.permute.xlu1 %837  ;;  %v836_v15 = vpop.permute.xlu0 %835 }
 0x35b   : > { %902 = vst.msk [vmem:[%s1494_s30 + $0xf8] sm:$0xff] %vm314_vm1, %v838_v45  ;;  %901 = vst.msk [vmem:[%s1494_s30 + $0xf0] sm:$0xff] %vm314_vm1, %v836_v15 }
 0x35c PF: > { %s16_s23 = sadd.s32 1, %s1091_s23   ;;  %s1576_s21 = smov %s1087_s22 }
 0x35d   : > { %p13_p5 = scmp.ge.s32.totalorder %s16_s23, 4   ;;  %s1577_s22 = smov %s1579_s24 }
 0x35f   :  { %15 = sbr.rel (!%p13_p5) target bundleno = 2 (0x2), region = 77 }

// kernel: splat_conv2d_forward.2
= control target key start
LH: loop header
LB: loop body
LE: loop exit
PB: predicated region body
PF: predicated region fallthrough
CT: control target
= control target key end

     0   :  { %s1279_s12 = smov 0   ;;  %s1281_s13 = smov 0   ;;  %s1798_s0 = inlined_call_operand.vmem [shape: bf16[2,256,128], index: 0, kind: input, shape index: {}]   ;;  %s1799_s1 = inlined_call_operand.vmem [shape: bf16[128,16], index: 1, kind: input, shape index: {}]   ;;  %s1800_s2 = inlined_call_operand.vmem [shape: f32[2,256,16], index: 2, kind: output, shape index: {0}]   ;;  %s1801_s3 = inlined_call_operand.vmem [shape: f32[2,1,16], index: 3, kind: output, shape index: {1}]  }
   0x1   :  { %s1283_s14 = smov 0  }
   0x2 LB: > { %s33_s15 = sadd.s32 1, %s1252_s13  ;;  %p1064_p0 = scmp.ge.s32.totalorder %s1256_s14, 1  ;;  %s1256_s14 = sphi %s1283_s14, %s14_s14   ;;  %s1252_s13 = sphi %s1281_s13, %s1803_s13   ;;  %s1248_s12 = sphi %s1279_s12, %s1802_s12  }
   0x3   : > { %p35_p1 = scmp.ge.s32.totalorder %s33_s15, 2  ;;  %p184_p2 = scmp.lt.s32.totalorder %s1256_s14, 3 }
   0x5   : > { %s1805_s15 = smov (%p35_p1, %s33_s15), 0  ;;  %p185_p3 = pnand %p1064_p0, %p184_p2 }
   0x6   : > { %p228_p4 = scmp.lt.s32.totalorder (!%p185_p3), %s1248_s12, 1 }
   0x7   : > { %188 = sbr.rel (%p185_p3) target bundleno = 334 (0x14e), region = 28 }
   0xc   : > { %v1210_v0 = vld [vmem:[%s1799_s1 + $0x38] sm:$0xff]   ;;  %v1211_v1 = vld [vmem:[%s1799_s1 + $0x30] sm:$0xff]   ;;  %s1807_s12 = smov (!%p228_p4, %s1248_s12), 1  ;;  %v1212_v2 = vld [vmem:[%s1799_s1 + $0x28] sm:$0xff]   ;;  %vm271_vm0 = vcmask 130048   ;;  %v1258_v4 = vmov 0.0  }
   0xd   : > { %1121 = vmatprep.subr.bf16.mxu0 %v1210_v0  ;;  %1169 = vmatprep.subr.bf16.mxu1 %v1210_v0  ;;  %s1095_s22 = sshll.u32 %s1807_s12, 7  ;;  %s1096_s26 = sshll.u32 %s1807_s12, 8  ;;  %v1213_v3 = vld [vmem:[%s1799_s1 + $0x20] sm:$0xff]   ;;  %v1214_v6 = vld [vmem:[%s1799_s1 + $0x18] sm:$0xff]   ;;  %v1215_v7 = vld [vmem:[%s1799_s1 + $0x10] sm:$0xff]   ;;  %vm266_vm1 = vcmask 122880  }
   0xe   : > { %1122 = vmatpush3.bf16.msra.mxu0 %v1210_v0  ;;  %1177 = vmatpush3.bf16.msra.mxu1 %v1210_v0  ;;  %s1312_s25 = scalar_lea.vmem %s1798_s0, %s1095_s22  ;;  %s1318_s29 = scalar_lea.vmem %s1800_s2, %s1096_s26  ;;  %v1216_v9 = vld [vmem:[%s1799_s1 + $0x8] sm:$0xff]   ;;  %v1217_v10 = vld [vmem:[%s1799_s1] sm:$0xff]  }
   0xf   : > { %1123 = vmatprep.subr.bf16.mxu0 %v1211_v1  ;;  %1170 = vmatprep.subr.bf16.mxu1 %v1211_v1  ;;  %274 = vst.msk [vmem:[%s1318_s29 + $0x10] sm:$0xff] %vm271_vm0, %v1258_v4  ;;  %272 = vst.msk [vmem:[%s1318_s29] sm:$0xff] %vm271_vm0, %v1258_v4  ;;  %v1218_v5 = vld [vmem:[%s1312_s25] sm:$0xff]   ;;  %v1219_v11 = vld [vmem:[%s1312_s25 + $0x8] sm:$0xff]   ;;  %s1451_s19 = scalar_lea.vmem %s1801_s3, %s1807_s12 }
  0x10   : > { %273 = vst.msk [vmem:[%s1318_s29 + $0x8] sm:$0xff] %vm271_vm0, %v1258_v4  ;;  %275 = vst.msk [vmem:[%s1318_s29 + $0x18] sm:$0xff] %vm271_vm0, %v1258_v4  ;;  %1137 = vmatprep.mubr.bf16.mxu0 %v1218_v5  ;;  %v1226_v8 = vld [vmem:[%s1312_s25 + $0x40] sm:$0xff]   ;;  %v1227_v12 = vld [vmem:[%s1312_s25 + $0x48] sm:$0xff]  }
  0x11   : > { %276 = vst.msk [vmem:[%s1318_s29 + $0x20] sm:$0xff] %vm271_vm0, %v1258_v4  ;;  %277 = vst.msk [vmem:[%s1318_s29 + $0x28] sm:$0xff] %vm271_vm0, %v1258_v4  ;;  %1153 = vmatprep.mubr.bf16.mxu1 %v1226_v8  ;;  %v1220_v13 = vld [vmem:[%s1312_s25 + $0x10] sm:$0xff]   ;;  %v1221_v15 = vld [vmem:[%s1312_s25 + $0x18] sm:$0xff]  }
  0x12   : > { %1124 = vmatpush3.bf16.msra.mxu0 %v1211_v1  ;;  %1178 = vmatpush3.bf16.msra.mxu1 %v1211_v1  ;;  %278 = vst.msk [vmem:[%s1318_s29 + $0x30] sm:$0xff] %vm271_vm0, %v1258_v4  ;;  %279 = vst.msk [vmem:[%s1318_s29 + $0x38] sm:$0xff] %vm271_vm0, %v1258_v4  ;;  %v1228_v14 = vld [vmem:[%s1312_s25 + $0x50] sm:$0xff]   ;;  %v1229_v16 = vld [vmem:[%s1312_s25 + $0x58] sm:$0xff]  }
  0x13   : > { %280 = vst.msk [vmem:[%s1318_s29 + $0x40] sm:$0xff] %vm271_vm0, %v1258_v4  ;;  %281 = vst.msk [vmem:[%s1318_s29 + $0x48] sm:$0xff] %vm271_vm0, %v1258_v4  ;;  %1125 = vmatprep.subr.bf16.mxu0 %v1212_v2  ;;  %1171 = vmatprep.subr.bf16.mxu1 %v1212_v2  ;;  %v1222_v17 = vld [vmem:[%s1312_s25 + $0x20] sm:$0xff]   ;;  %v1223_v19 = vld [vmem:[%s1312_s25 + $0x28] sm:$0xff]  }
  0x14   : > { %282 = vst.msk [vmem:[%s1318_s29 + $0x50] sm:$0xff] %vm271_vm0, %v1258_v4  ;;  %283 = vst.msk [vmem:[%s1318_s29 + $0x58] sm:$0xff] %vm271_vm0, %v1258_v4  ;;  %v1230_v18 = vld [vmem:[%s1312_s25 + $0x60] sm:$0xff]   ;;  %v1231_v20 = vld [vmem:[%s1312_s25 + $0x68] sm:$0xff]  }
  0x15   : > { %284 = vst.msk [vmem:[%s1318_s29 + $0x60] sm:$0xff] %vm271_vm0, %v1258_v4  ;;  %285 = vst.msk [vmem:[%s1318_s29 + $0x68] sm:$0xff] %vm271_vm0, %v1258_v4  ;;  %v1224_v21 = vld [vmem:[%s1312_s25 + $0x30] sm:$0xff]   ;;  %v1225_v23 = vld [vmem:[%s1312_s25 + $0x38] sm:$0xff]  }
  0x16   : > { %286 = vst.msk [vmem:[%s1318_s29 + $0x70] sm:$0xff] %vm271_vm0, %v1258_v4  ;;  %287 = vst.msk [vmem:[%s1318_s29 + $0x78] sm:$0xff] %vm271_vm0, %v1258_v4  ;;  %1126 = vmatpush3.bf16.msra.mxu0 %v1212_v2  ;;  %1179 = vmatpush3.bf16.msra.mxu1 %v1212_v2  ;;  %v1232_v22 = vld [vmem:[%s1312_s25 + $0x70] sm:$0xff]   ;;  %v1233_v24 = vld [vmem:[%s1312_s25 + $0x78] sm:$0xff]  }
  0x17   : > { %288 = vst.msk [vmem:[%s1318_s29 + $0x80] sm:$0xff] %vm271_vm0, %v1258_v4  ;;  %289 = vst.msk [vmem:[%s1318_s29 + $0x88] sm:$0xff] %vm271_vm0, %v1258_v4  ;;  %1127 = vmatprep.subr.bf16.mxu0 %v1213_v3  ;;  %1172 = vmatprep.subr.bf16.mxu1 %v1213_v3  ;;  %v306_v25 = vld [vmem:[%s1318_s29 + $0x10] sm:$0xff]  ;;  %v304_v28 = vld [vmem:[%s1318_s29] sm:$0xff] }
  0x18   : > { %290 = vst.msk [vmem:[%s1318_s29 + $0x90] sm:$0xff] %vm271_vm0, %v1258_v4  ;;  %291 = vst.msk [vmem:[%s1318_s29 + $0x98] sm:$0xff] %vm271_vm0, %v1258_v4  ;;  %v307_v34 = vld [vmem:[%s1318_s29 + $0x18] sm:$0xff]  ;;  %v305_v40 = vld [vmem:[%s1318_s29 + $0x8] sm:$0xff] }
  0x19   : > { %292 = vst.msk [vmem:[%s1318_s29 + $0xa0] sm:$0xff] %vm271_vm0, %v1258_v4  ;;  %293 = vst.msk [vmem:[%s1318_s29 + $0xa8] sm:$0xff] %vm271_vm0, %v1258_v4  ;;  %v310_v46 = vld [vmem:[%s1318_s29 + $0x30] sm:$0xff]  ;;  %v308_v52 = vld [vmem:[%s1318_s29 + $0x20] sm:$0xff] }
  0x1a   : > { %294 = vst.msk [vmem:[%s1318_s29 + $0xb0] sm:$0xff] %vm271_vm0, %v1258_v4  ;;  %295 = vst.msk [vmem:[%s1318_s29 + $0xb8] sm:$0xff] %vm271_vm0, %v1258_v4  ;;  %1128 = vmatpush3.bf16.msra.mxu0 %v1213_v3  ;;  %1180 = vmatpush3.bf16.msra.mxu1 %v1213_v3  ;;  %v311_v59 = vld [vmem:[%s1318_s29 + $0x38] sm:$0xff]  ;;  %v309_v5 = vld [vmem:[%s1318_s29 + $0x28] sm:$0xff] }
  0x1b   : > { %296 = vst.msk [vmem:[%s1318_s29 + $0xc0] sm:$0xff] %vm271_vm0, %v1258_v4  ;;  %297 = vst.msk [vmem:[%s1318_s29 + $0xc8] sm:$0xff] %vm271_vm0, %v1258_v4  ;;  %1129 = vmatprep.subr.bf16.mxu0 %v1214_v6  ;;  %1173 = vmatprep.subr.bf16.mxu1 %v1214_v6 }
  0x1c   : > { %298 = vst.msk [vmem:[%s1318_s29 + $0xd0] sm:$0xff] %vm271_vm0, %v1258_v4  ;;  %299 = vst.msk [vmem:[%s1318_s29 + $0xd8] sm:$0xff] %vm271_vm0, %v1258_v4 }
  0x1d   : > { %300 = vst.msk [vmem:[%s1318_s29 + $0xe0] sm:$0xff] %vm271_vm0, %v1258_v4  ;;  %301 = vst.msk [vmem:[%s1318_s29 + $0xe8] sm:$0xff] %vm271_vm0, %v1258_v4 }
  0x1e   : > { %302 = vst.msk [vmem:[%s1318_s29 + $0xf0] sm:$0xff] %vm271_vm0, %v1258_v4  ;;  %303 = vst.msk [vmem:[%s1318_s29 + $0xf8] sm:$0xff] %vm271_vm0, %v1258_v4  ;;  %1130 = vmatpush3.bf16.msra.mxu0 %v1214_v6  ;;  %1181 = vmatpush3.bf16.msra.mxu1 %v1214_v6  ;;  %v320_v30 = vld [vmem:[%s1318_s29 + $0x80] sm:$0xff]  ;;  %v321_v42 = vld [vmem:[%s1318_s29 + $0x88] sm:$0xff] }
  0x1f   : > { %1131 = vmatprep.subr.bf16.mxu0 %v1215_v7  ;;  %1174 = vmatprep.subr.bf16.mxu1 %v1215_v7  ;;  %267 = vst.msk [vmem:[%s1451_s19] sm:$0x1] %vm266_vm1, %v1258_v4  ;;  %v322_v26 = vld [vmem:[%s1318_s29 + $0x90] sm:$0xff]  ;;  %v323_v36 = vld [vmem:[%s1318_s29 + $0x98] sm:$0xff] }
  0x20   : > { %v324_v54 = vld [vmem:[%s1318_s29 + $0xa0] sm:$0xff] }
  0x21   : > { %v326_v48 = vld [vmem:[%s1318_s29 + $0xb0] sm:$0xff]  ;;  %v327_v2 = vld [vmem:[%s1318_s29 + $0xb8] sm:$0xff] }
  0x22   : > { %1132 = vmatpush3.bf16.msra.mxu0 %v1215_v7  ;;  %1182 = vmatpush3.bf16.msra.mxu1 %v1215_v7 }
  0x23   : > { %1133 = vmatprep.subr.bf16.mxu0 %v1216_v9  ;;  %1175 = vmatprep.subr.bf16.mxu1 %v1216_v9 }
  0x26   : > { %1134 = vmatpush3.bf16.msra.mxu0 %v1216_v9  ;;  %1183 = vmatpush3.bf16.msra.mxu1 %v1216_v9 }
  0x27   : > { %1135 = vmatprep.subr.bf16.mxu0 %v1217_v10  ;;  %1176 = vmatprep.subr.bf16.mxu1 %v1217_v10 }
  0x2a   : > { %1136 = vmatpush3.bf16.msra.mxu0 %v1217_v10  ;;  %1184 = vmatpush3.bf16.msra.mxu1 %v1217_v10  ;;  %v325_v10 = vld [vmem:[%s1318_s29 + $0xa8] sm:$0xff] }
  0x2d   : > { %1138 = vmatmul.mubr.bf16.vlgmr.msra.gmra.mxu0 %v1219_v11  ;;  %1154 = vmatmul.mubr.bf16.vlgmr.msra.gmra.mxu1 %v1227_v12 }
  0x2e   : > { %1141 = vmatprep.mubr.bf16.mxu0 %v1220_v13  ;;  %1157 = vmatprep.mubr.bf16.mxu1 %v1228_v14  ;;  %v314_v13 = vld [vmem:[%s1318_s29 + $0x50] sm:$0xff] }
  0x35   : > { %1142 = vmatmul.mubr.bf16.gmra.mxu0 %v1221_v15  ;;  %1158 = vmatmul.mubr.bf16.gmra.mxu1 %v1229_v16 }
  0x36   : > { %1145 = vmatprep.mubr.bf16.mxu0 %v1222_v17  ;;  %1161 = vmatprep.mubr.bf16.mxu1 %v1230_v18 }
  0x3d   : > { %1146 = vmatmul.mubr.bf16.gmra.mxu0 %v1223_v19  ;;  %1162 = vmatmul.mubr.bf16.gmra.mxu1 %v1231_v20 }
  0x3e   : > { %1149 = vmatprep.mubr.bf16.mxu0 %v1224_v21  ;;  %1165 = vmatprep.mubr.bf16.mxu1 %v1232_v22  ;;  %v330_v21 = vld [vmem:[%s1318_s29 + $0xd0] sm:$0xff] }
  0x45   : > { %1150 = vmatmul.mubr.bf16.gmra.mxu0 %v1225_v23  ;;  %1166 = vmatmul.mubr.bf16.gmra.mxu1 %v1233_v24  ;;  %v312_v24 = vld [vmem:[%s1318_s29 + $0x40] sm:$0xff] }
  0xed   : > { %v1139_v27 = vpop.f32.mrf.mxu0  ;;  %v1155_v29 = vpop.f32.mrf.mxu1 }
  0xee   : > { %v691_v31 = vadd.f32 %v1139_v27, %v306_v25  ;;  %v707_v32 = vadd.f32 %v1155_v29, %v322_v26 }
  0xef   : > { %v562_v33 = vpop.f32.mrf.mxu0  ;;  %v626_v35 = vpop.f32.mrf.mxu1 }
  0xf0   : > { %724 = vst.msk [vmem:[%s1318_s29 + $0x10] sm:$0xff] %vm271_vm0, %v691_v31  ;;  %v689_v37 = vadd.f32 %v562_v33, %v304_v28  ;;  %740 = vst.msk [vmem:[%s1318_s29 + $0x90] sm:$0xff] %vm271_vm0, %v707_v32  ;;  %v705_v38 = vadd.f32 %v626_v35, %v320_v30  ;;  %v328_v30 = vld [vmem:[%s1318_s29 + $0xc0] sm:$0xff] }
  0xf1   : > { %v1140_v39 = vpop.f32.mrf.mxu0  ;;  %v1156_v41 = vpop.f32.mrf.mxu1 }
  0xf2   : > { %722 = vst.msk [vmem:[%s1318_s29] sm:$0xff] %vm271_vm0, %v689_v37  ;;  %v692_v43 = vadd.f32 %v1140_v39, %v307_v34  ;;  %738 = vst.msk [vmem:[%s1318_s29 + $0x80] sm:$0xff] %vm271_vm0, %v705_v38  ;;  %v708_v44 = vadd.f32 %v1156_v41, %v323_v36  ;;  %v315_v34 = vld [vmem:[%s1318_s29 + $0x58] sm:$0xff] }
  0xf3   : > { %v565_v45 = vpop.f32.mrf.mxu0  ;;  %v629_v47 = vpop.f32.mrf.mxu1 }
  0xf4   : > { %725 = vst.msk [vmem:[%s1318_s29 + $0x18] sm:$0xff] %vm271_vm0, %v692_v43  ;;  %v690_v49 = vadd.f32 %v565_v45, %v305_v40  ;;  %741 = vst.msk [vmem:[%s1318_s29 + $0x98] sm:$0xff] %vm271_vm0, %v708_v44  ;;  %v706_v50 = vadd.f32 %v629_v47, %v321_v42  ;;  %v313_v42 = vld [vmem:[%s1318_s29 + $0x48] sm:$0xff]  ;;  %v331_v44 = vld [vmem:[%s1318_s29 + $0xd8] sm:$0xff] }
  0xf5   : > { %v1143_v51 = vpop.f32.mrf.mxu0  ;;  %v1159_v53 = vpop.f32.mrf.mxu1 }
  0xf6   : > { %723 = vst.msk [vmem:[%s1318_s29 + $0x8] sm:$0xff] %vm271_vm0, %v690_v49  ;;  %v695_v55 = vadd.f32 %v1143_v51, %v310_v46  ;;  %739 = vst.msk [vmem:[%s1318_s29 + $0x88] sm:$0xff] %vm271_vm0, %v706_v50  ;;  %v711_v56 = vadd.f32 %v1159_v53, %v326_v48  ;;  %v329_v51 = vld [vmem:[%s1318_s29 + $0xc8] sm:$0xff] }
  0xf7   : > { %v1485_v57 = vld [vmem:[%s1318_s29 + $0x10] sm:$0xff]  ;;  %v578_v58 = vpop.f32.mrf.mxu0  ;;  %v642_v61 = vpop.f32.mrf.mxu1 }
  0xf8   : > { %v1489_v60 = vld [vmem:[%s1318_s29 + $0x90] sm:$0xff]  ;;  %v791_v62 = vmax.f32 %v1485_v57, 0.0  ;;  %728 = vst.msk [vmem:[%s1318_s29 + $0x30] sm:$0xff] %vm271_vm0, %v695_v55  ;;  %v693_v63 = vadd.f32 %v578_v58, %v308_v52  ;;  %744 = vst.msk [vmem:[%s1318_s29 + $0xb0] sm:$0xff] %vm271_vm0, %v711_v56  ;;  %v709_v1 = vadd.f32 %v642_v61, %v324_v54 }
  0xf9   : > { %v807_v0 = vmax.f32 %v1489_v60, 0.0  ;;  %v757_v3 = vld [vmem:[%s1318_s29] sm:$0xff]  ;;  %v1144_v4 = vpop.f32.mrf.mxu0  ;;  %v1160_v7 = vpop.f32.mrf.mxu1  ;;  %v318_v58 = vld [vmem:[%s1318_s29 + $0x70] sm:$0xff] }
  0xfa   : > { %v1501_v6 = vld [vmem:[%s1318_s29 + $0x80] sm:$0xff]  ;;  %823 = vst.msk [vmem:[%s1318_s29 + $0x10] sm:$0xff] %vm271_vm0, %v791_v62  ;;  %v789_v8 = vmax.f32 %v757_v3, 0.0  ;;  %726 = vst.msk [vmem:[%s1318_s29 + $0x20] sm:$0xff] %vm271_vm0, %v693_v63  ;;  %v696_v9 = vadd.f32 %v1144_v4, %v311_v59  ;;  %v712_v16 = vadd.f32 %v1160_v7, %v327_v2  ;;  %v857_v52 = vsel %vm271_vm0, %v791_v62, 0.0  ;;  %v334_v63 = vld [vmem:[%s1318_s29 + $0xf0] sm:$0xff] }
  0xfb   : > { %839 = vst.msk [vmem:[%s1318_s29 + $0x90] sm:$0xff] %vm271_vm0, %v807_v0  ;;  %742 = vst.msk [vmem:[%s1318_s29 + $0xa0] sm:$0xff] %vm271_vm0, %v709_v1  ;;  %v1517_v11 = vld [vmem:[%s1318_s29 + $0x18] sm:$0xff]  ;;  %v581_v12 = vpop.f32.mrf.mxu0  ;;  %v805_v14 = vmax.f32 %v1501_v6, 0.0  ;;  %v645_v17 = vpop.f32.mrf.mxu1 }
  0xfc   : > { %v1522_v15 = vld [vmem:[%s1318_s29 + $0x98] sm:$0xff]  ;;  %821 = vst.msk [vmem:[%s1318_s29] sm:$0xff] %vm271_vm0, %v789_v8  ;;  %v792_v18 = vmax.f32 %v1517_v11, 0.0  ;;  %729 = vst.msk [vmem:[%s1318_s29 + $0x38] sm:$0xff] %vm271_vm0, %v696_v9  ;;  %v694_v19 = vadd.f32 %v581_v12, %v309_v5  ;;  %v710_v26 = vadd.f32 %v645_v17, %v325_v10  ;;  %v854_v31 = vsel %vm271_vm0, %v789_v8, 0.0  ;;  %v316_v10 = vld [vmem:[%s1318_s29 + $0x60] sm:$0xff] }
  0xfd   : > { %v808_v20 = vmax.f32 %v1522_v15, 0.0  ;;  %v758_v22 = vld [vmem:[%s1318_s29 + $0x8] sm:$0xff]  ;;  %v1147_v23 = vpop.f32.mrf.mxu0  ;;  %837 = vst.msk [vmem:[%s1318_s29 + $0x80] sm:$0xff] %vm271_vm0, %v805_v14  ;;  %745 = vst.msk [vmem:[%s1318_s29 + $0xb8] sm:$0xff] %vm271_vm0, %v712_v16  ;;  %v1163_v27 = vpop.f32.mrf.mxu1 }
  0xfe   : > { %v1538_v25 = vld [vmem:[%s1318_s29 + $0x88] sm:$0xff]  ;;  %824 = vst.msk [vmem:[%s1318_s29 + $0x18] sm:$0xff] %vm271_vm0, %v792_v18  ;;  %v790_v28 = vmax.f32 %v758_v22, 0.0  ;;  %727 = vst.msk [vmem:[%s1318_s29 + $0x28] sm:$0xff] %vm271_vm0, %v694_v19  ;;  %v699_v29 = vadd.f32 %v1147_v23, %v314_v13  ;;  %v715_v37 = vadd.f32 %v1163_v27, %v330_v21  ;;  %v859_v1 = vsel %vm271_vm0, %v792_v18, 0.0  ;;  %v332_v13 = vld [vmem:[%s1318_s29 + $0xe0] sm:$0xff] }
  0xff   : > { %840 = vst.msk [vmem:[%s1318_s29 + $0x98] sm:$0xff] %vm271_vm0, %v808_v20  ;;  %v1553_v32 = vld [vmem:[%s1318_s29 + $0x30] sm:$0xff]  ;;  %v594_v33 = vpop.f32.mrf.mxu0  ;;  %v806_v35 = vmax.f32 %v1538_v25, 0.0  ;;  %743 = vst.msk [vmem:[%s1318_s29 + $0xa8] sm:$0xff] %vm271_vm0, %v710_v26  ;;  %v658_v38 = vpop.f32.mrf.mxu1  ;;  %v319_v26 = vld [vmem:[%s1318_s29 + $0x78] sm:$0xff] }
 0x100   : > { %v1558_v36 = vld [vmem:[%s1318_s29 + $0xb0] sm:$0xff]  ;;  %822 = vst.msk [vmem:[%s1318_s29 + $0x8] sm:$0xff] %vm271_vm0, %v790_v28  ;;  %v855_v39 = vsel %vm271_vm0, %v790_v28, 0.0  ;;  %v795_v40 = vmax.f32 %v1553_v32, 0.0  ;;  %732 = vst.msk [vmem:[%s1318_s29 + $0x50] sm:$0xff] %vm271_vm0, %v699_v29  ;;  %v697_v41 = vadd.f32 %v594_v33, %v312_v24  ;;  %v713_v49 = vadd.f32 %v658_v38, %v328_v30  ;;  %v335_v29 = vld [vmem:[%s1318_s29 + $0xf8] sm:$0xff] }
 0x101   : > { %v811_v43 = vmax.f32 %v1558_v36, 0.0  ;;  %v856_v45 = vadd.f32 %v855_v39, %v854_v31  ;;  %v761_v46 = vld [vmem:[%s1318_s29 + $0x20] sm:$0xff]  ;;  %v1148_v47 = vpop.f32.mrf.mxu0  ;;  %838 = vst.msk [vmem:[%s1318_s29 + $0x88] sm:$0xff] %vm271_vm0, %v806_v35  ;;  %748 = vst.msk [vmem:[%s1318_s29 + $0xd0] sm:$0xff] %vm271_vm0, %v715_v37  ;;  %v1164_v50 = vpop.f32.mrf.mxu1 }
 0x102   : > { %v1577_v48 = vld [vmem:[%s1318_s29 + $0xa0] sm:$0xff]  ;;  %827 = vst.msk [vmem:[%s1318_s29 + $0x30] sm:$0xff] %vm271_vm0, %v795_v40  ;;  %v793_v53 = vmax.f32 %v761_v46, 0.0  ;;  %730 = vst.msk [vmem:[%s1318_s29 + $0x40] sm:$0xff] %vm271_vm0, %v697_v41  ;;  %v700_v54 = vadd.f32 %v1148_v47, %v315_v34  ;;  %v716_v61 = vadd.f32 %v1164_v50, %v331_v44  ;;  %v333_v46 = vld [vmem:[%s1318_s29 + $0xe8] sm:$0xff]  ;;  %v865_v47 = vsel %vm271_vm0, %v795_v40, 0.0 }
 0x103   : > { %843 = vst.msk [vmem:[%s1318_s29 + $0xb0] sm:$0xff] %vm271_vm0, %v811_v43  ;;  %v858_v55 = vadd.f32 %v857_v52, %v856_v45  ;;  %v1596_v56 = vld [vmem:[%s1318_s29 + $0x38] sm:$0xff]  ;;  %v597_v57 = vpop.f32.mrf.mxu0  ;;  %v809_v59 = vmax.f32 %v1577_v48, 0.0  ;;  %746 = vst.msk [vmem:[%s1318_s29 + $0xc0] sm:$0xff] %vm271_vm0, %v713_v49  ;;  %v661_v62 = vpop.f32.mrf.mxu1  ;;  %v897_v60 = vsel %vm271_vm0, %v811_v43, 0.0 }
 0x104   : > { %825 = vst.msk [vmem:[%s1318_s29 + $0x20] sm:$0xff] %vm271_vm0, %v793_v53  ;;  %v796_v2 = vmax.f32 %v1596_v56, 0.0  ;;  %733 = vst.msk [vmem:[%s1318_s29 + $0x58] sm:$0xff] %vm271_vm0, %v700_v54  ;;  %v698_v3 = vadd.f32 %v597_v57, %v313_v42  ;;  %v1610_v4 = vld [vmem:[%s1318_s29 + $0xb8] sm:$0xff]  ;;  %v714_v5 = vadd.f32 %v661_v62, %v329_v51  ;;  %v861_v16 = vsel %vm271_vm0, %v793_v53, 0.0  ;;  %v317_v42 = vld [vmem:[%s1318_s29 + $0x68] sm:$0xff] }
 0x105   : > { %v860_v7 = vadd.f32 %v859_v1, %v858_v55  ;;  %v762_v8 = vld [vmem:[%s1318_s29 + $0x28] sm:$0xff]  ;;  %v1151_v9 = vpop.f32.mrf.mxu0  ;;  %841 = vst.msk [vmem:[%s1318_s29 + $0xa0] sm:$0xff] %vm271_vm0, %v809_v59  ;;  %v812_v11 = vmax.f32 %v1610_v4, 0.0  ;;  %749 = vst.msk [vmem:[%s1318_s29 + $0xd8] sm:$0xff] %vm271_vm0, %v716_v61  ;;  %v1167_v12 = vpop.f32.mrf.mxu1  ;;  %v893_v6 = vsel %vm271_vm0, %v809_v59, 0.0 }
 0x106   : > { %828 = vst.msk [vmem:[%s1318_s29 + $0x38] sm:$0xff] %vm271_vm0, %v796_v2  ;;  %v794_v17 = vmax.f32 %v762_v8, 0.0  ;;  %731 = vst.msk [vmem:[%s1318_s29 + $0x48] sm:$0xff] %vm271_vm0, %v698_v3  ;;  %v703_v18 = vadd.f32 %v1151_v9, %v318_v58  ;;  %v1628_v19 = vld [vmem:[%s1318_s29 + $0xa8] sm:$0xff]  ;;  %v719_v21 = vadd.f32 %v1167_v12, %v334_v63  ;;  %v867_v56 = vsel %vm271_vm0, %v796_v2, 0.0 }
 0x107   : > { %747 = vst.msk [vmem:[%s1318_s29 + $0xc8] sm:$0xff] %vm271_vm0, %v714_v5  ;;  %v862_v22 = vadd.f32 %v861_v16, %v860_v7  ;;  %v1633_v23 = vld [vmem:[%s1318_s29 + $0x50] sm:$0xff]  ;;  %v610_v24 = vpop.f32.mrf.mxu0  ;;  %844 = vst.msk [vmem:[%s1318_s29 + $0xb8] sm:$0xff] %vm271_vm0, %v812_v11  ;;  %v810_v27 = vmax.f32 %v1628_v19, 0.0  ;;  %v674_v28 = vpop.f32.mrf.mxu1  ;;  %v899_v15 = vsel %vm271_vm0, %v812_v11, 0.0 }
 0x108   : > { %826 = vst.msk [vmem:[%s1318_s29 + $0x28] sm:$0xff] %vm271_vm0, %v794_v17  ;;  %v863_v30 = vsel %vm271_vm0, %v794_v17, 0.0  ;;  %v799_v31 = vmax.f32 %v1633_v23, 0.0  ;;  %736 = vst.msk [vmem:[%s1318_s29 + $0x70] sm:$0xff] %vm271_vm0, %v703_v18  ;;  %v701_v33 = vadd.f32 %v610_v24, %v316_v10  ;;  %v1649_v34 = vld [vmem:[%s1318_s29 + $0xd0] sm:$0xff]  ;;  %v717_v37 = vadd.f32 %v674_v28, %v332_v13 }
 0x109   : > { %752 = vst.msk [vmem:[%s1318_s29 + $0xf0] sm:$0xff] %vm271_vm0, %v719_v21  ;;  %v864_v38 = vadd.f32 %v863_v30, %v862_v22  ;;  %v765_v39 = vld [vmem:[%s1318_s29 + $0x40] sm:$0xff]  ;;  %v1152_v41 = vpop.f32.mrf.mxu0  ;;  %842 = vst.msk [vmem:[%s1318_s29 + $0xa8] sm:$0xff] %vm271_vm0, %v810_v27  ;;  %v815_v44 = vmax.f32 %v1649_v34, 0.0  ;;  %v1168_v45 = vpop.f32.mrf.mxu1  ;;  %v895_v25 = vsel %vm271_vm0, %v810_v27, 0.0 }
 0x10a   : > { %831 = vst.msk [vmem:[%s1318_s29 + $0x50] sm:$0xff] %vm271_vm0, %v799_v31  ;;  %v797_v49 = vmax.f32 %v765_v39, 0.0  ;;  %734 = vst.msk [vmem:[%s1318_s29 + $0x60] sm:$0xff] %vm271_vm0, %v701_v33  ;;  %v704_v50 = vadd.f32 %v1152_v41, %v319_v26  ;;  %v1669_v51 = vld [vmem:[%s1318_s29 + $0xc0] sm:$0xff]  ;;  %v720_v52 = vadd.f32 %v1168_v45, %v335_v29  ;;  %v873_v23 = vsel %vm271_vm0, %v799_v31, 0.0 }
 0x10b   : > { %750 = vst.msk [vmem:[%s1318_s29 + $0xe0] sm:$0xff] %vm271_vm0, %v717_v37  ;;  %v866_v53 = vadd.f32 %v865_v47, %v864_v38  ;;  %v768_v32 = vld [vmem:[%s1318_s29 + $0x58] sm:$0xff]  ;;  %v613_v54 = vpop.f32.mrf.mxu0  ;;  %847 = vst.msk [vmem:[%s1318_s29 + $0xd0] sm:$0xff] %vm271_vm0, %v815_v44  ;;  %v813_v40 = vmax.f32 %v1669_v51, 0.0  ;;  %v677_v55 = vpop.f32.mrf.mxu1  ;;  %v905_v36 = vsel %vm271_vm0, %v815_v44, 0.0 }
 0x10c   : > { %829 = vst.msk [vmem:[%s1318_s29 + $0x40] sm:$0xff] %vm271_vm0, %v797_v49  ;;  %v800_v57 = vmax.f32 %v768_v32, 0.0  ;;  %737 = vst.msk [vmem:[%s1318_s29 + $0x78] sm:$0xff] %vm271_vm0, %v704_v50  ;;  %v702_v58 = vadd.f32 %v613_v54, %v317_v42  ;;  %v1685_v61 = vld [vmem:[%s1318_s29 + $0xd8] sm:$0xff]  ;;  %v718_v62 = vadd.f32 %v677_v55, %v333_v46  ;;  %v869_v5 = vsel %vm271_vm0, %v797_v49, 0.0 }
 0x10d   : > { %753 = vst.msk [vmem:[%s1318_s29 + $0xf8] sm:$0xff] %vm271_vm0, %v720_v52  ;;  %v868_v63 = vadd.f32 %v867_v56, %v866_v53  ;;  %v766_v1 = vld [vmem:[%s1318_s29 + $0x48] sm:$0xff]  ;;  %845 = vst.msk [vmem:[%s1318_s29 + $0xc0] sm:$0xff] %vm271_vm0, %v813_v40  ;;  %v816_v2 = vmax.f32 %v1685_v61, 0.0  ;;  %v885_v55 = vsel %vm271_vm0, %v805_v14, 0.0  ;;  %v901_v48 = vsel %vm271_vm0, %v813_v40, 0.0 }
 0x10e   : > { %v1696_v3 = vld [vmem:[%s1318_s29 + $0xc8] sm:$0xff]  ;;  %832 = vst.msk [vmem:[%s1318_s29 + $0x58] sm:$0xff] %vm271_vm0, %v800_v57  ;;  %v798_v7 = vmax.f32 %v766_v1, 0.0  ;;  %735 = vst.msk [vmem:[%s1318_s29 + $0x68] sm:$0xff] %vm271_vm0, %v702_v58  ;;  %v875_v33 = vsel %vm271_vm0, %v800_v57, 0.0  ;;  %v887_v57 = vsel %vm271_vm0, %v806_v35, 0.0 }
 0x10f   : > { %v814_v8 = vmax.f32 %v1696_v3, 0.0  ;;  %751 = vst.msk [vmem:[%s1318_s29 + $0xe8] sm:$0xff] %vm271_vm0, %v718_v62  ;;  %v870_v9 = vadd.f32 %v869_v5, %v868_v63  ;;  %v771_v10 = vld [vmem:[%s1318_s29 + $0x70] sm:$0xff]  ;;  %848 = vst.msk [vmem:[%s1318_s29 + $0xd8] sm:$0xff] %vm271_vm0, %v816_v2  ;;  %v889_v62 = vsel %vm271_vm0, %v807_v0, 0.0  ;;  %v891_v1 = vsel %vm271_vm0, %v808_v20, 0.0 }
 0x110   : > { %v1712_v12 = vld [vmem:[%s1318_s29 + $0xf0] sm:$0xff]  ;;  %830 = vst.msk [vmem:[%s1318_s29 + $0x48] sm:$0xff] %vm271_vm0, %v798_v7  ;;  %v871_v13 = vsel %vm271_vm0, %v798_v7, 0.0  ;;  %v803_v16 = vmax.f32 %v771_v10, 0.0  ;;  %v907_v43 = vsel %vm271_vm0, %v816_v2, 0.0 }
 0x111   : > { %846 = vst.msk [vmem:[%s1318_s29 + $0xc8] sm:$0xff] %vm271_vm0, %v814_v8  ;;  %v819_v17 = vmax.f32 %v1712_v12, 0.0  ;;  %v872_v18 = vadd.f32 %v871_v13, %v870_v9  ;;  %v769_v21 = vld [vmem:[%s1318_s29 + $0x60] sm:$0xff]  ;;  %v903_v19 = vsel %vm271_vm0, %v814_v8, 0.0 }
 0x112   : > { %v785_v22 = vld [vmem:[%s1318_s29 + $0xe0] sm:$0xff]  ;;  %835 = vst.msk [vmem:[%s1318_s29 + $0x70] sm:$0xff] %vm271_vm0, %v803_v16  ;;  %v801_v24 = vmax.f32 %v769_v21, 0.0  ;;  %v881_v52 = vsel %vm271_vm0, %v803_v16, 0.0 }
 0x113   : > { %851 = vst.msk [vmem:[%s1318_s29 + $0xf0] sm:$0xff] %vm271_vm0, %v819_v17  ;;  %v817_v26 = vmax.f32 %v785_v22, 0.0  ;;  %v874_v28 = vadd.f32 %v873_v23, %v872_v18  ;;  %v772_v29 = vld [vmem:[%s1318_s29 + $0x78] sm:$0xff]  ;;  %v913_v8 = vsel %vm271_vm0, %v819_v17, 0.0  ;;  %v853_v2 = vld [vmem:[%s1451_s19] sm:$0x1] }
 0x114   : > { %v788_v30 = vld [vmem:[%s1318_s29 + $0xf8] sm:$0xff]  ;;  %833 = vst.msk [vmem:[%s1318_s29 + $0x60] sm:$0xff] %vm271_vm0, %v801_v24  ;;  %v804_v37 = vmax.f32 %v772_v29, 0.0  ;;  %v877_v42 = vsel %vm271_vm0, %v801_v24, 0.0 }
 0x115   : > { %849 = vst.msk [vmem:[%s1318_s29 + $0xe0] sm:$0xff] %vm271_vm0, %v817_v26  ;;  %v820_v31 = vmax.f32 %v788_v30, 0.0  ;;  %v876_v38 = vadd.f32 %v875_v33, %v874_v28  ;;  %v770_v39 = vld [vmem:[%s1318_s29 + $0x68] sm:$0xff]  ;;  %v909_v11 = vsel %vm271_vm0, %v817_v26, 0.0 }
 0x116   : > { %v786_v41 = vld [vmem:[%s1318_s29 + $0xe8] sm:$0xff]  ;;  %836 = vst.msk [vmem:[%s1318_s29 + $0x78] sm:$0xff] %vm271_vm0, %v804_v37  ;;  %v802_v45 = vmax.f32 %v770_v39, 0.0  ;;  %v883_v32 = vsel %vm271_vm0, %v804_v37, 0.0 }
 0x117   : > { %852 = vst.msk [vmem:[%s1318_s29 + $0xf8] sm:$0xff] %vm271_vm0, %v820_v31  ;;  %v818_v46 = vmax.f32 %v786_v41, 0.0  ;;  %v878_v47 = vadd.f32 %v877_v42, %v876_v38  ;;  %v915_v34 = vsel %vm271_vm0, %v820_v31, 0.0 }
 0x118   : > { %834 = vst.msk [vmem:[%s1318_s29 + $0x68] sm:$0xff] %vm271_vm0, %v802_v45  ;;  %v879_v49 = vsel %vm271_vm0, %v802_v45, 0.0 }
 0x119   : > { %850 = vst.msk [vmem:[%s1318_s29 + $0xe8] sm:$0xff] %vm271_vm0, %v818_v46  ;;  %v880_v50 = vadd.f32 %v879_v49, %v878_v47  ;;  %v911_v40 = vsel %vm271_vm0, %v818_v46, 0.0 }
 0x11b   : > { %v882_v53 = vadd.f32 %v881_v52, %v880_v50 }
 0x11d   : > { %v884_v54 = vadd.f32 %v883_v32, %v882_v53 }
 0x11f   : > { %v886_v56 = vadd.f32 %v885_v55, %v884_v54 }
 0x121   : > { %v888_v58 = vadd.f32 %v887_v57, %v886_v56 }
 0x123   : > { %v890_v63 = vadd.f32 %v889_v62, %v888_v58 }
 0x125   : > { %v892_v3 = vadd.f32 %v891_v1, %v890_v63 }
 0x127   : > { %v894_v14 = vadd.f32 %v893_v6, %v892_v3 }
 0x129   : > { %v896_v35 = vadd.f32 %v895_v25, %v894_v14 }
 0x12b   : > { %v898_v0 = vadd.f32 %v897_v60, %v896_v35 }
 0x12d   : > { %v900_v20 = vadd.f32 %v899_v15, %v898_v0 }
 0x12f   : > { %v902_v59 = vadd.f32 %v901_v48, %v900_v20 }
 0x131   : > { %v904_v5 = vadd.f32 %v903_v19, %v902_v59 }
 0x133   : > { %v906_v27 = vadd.f32 %v905_v36, %v904_v5 }
 0x135   : > { %v908_v4 = vadd.f32 %v907_v43, %v906_v27 }
 0x137   : > { %v910_v51 = vadd.f32 %v909_v11, %v908_v4 }
 0x139   : > { %v912_v7 = vadd.f32 %v911_v40, %v910_v51 }
 0x13b   : > { %v914_v9 = vadd.f32 %v913_v8, %v912_v7 }
 0x13d   : > { %v916_v44 = vadd.f32 %v915_v34, %v914_v9 }
 0x13f   : > { %v917_v10 = vrot.slane %v916_v44, 4 }
 0x141   : > { %v918_v12 = vadd.f32 %v917_v10, %v916_v44 }
 0x143   : > { %v919_v61 = vrot.slane %v918_v12, 2 }
 0x145   : > { %v920_v13 = vadd.f32 %v919_v61, %v918_v12 }
 0x147   : > { %v921_v16 = vrot.slane %v920_v13, 1 }
 0x149   : > { %v922_v18 = vadd.f32 %v921_v16, %v920_v13 }
 0x14b   : > { %v923_v21 = vadd.f32 %v922_v18, %v853_v2 }
 0x14d   : > { %925 = vst.msk [vmem:[%s1451_s19] sm:$0x1] %vm266_vm1, %v923_v21 }
 0x14e PF: > { %s14_s14 = sadd.s32 1, %s1256_s14   ;;  %s1802_s12 = smov %s1252_s13 }
 0x14f   : > { %p11_p5 = scmp.ge.s32.totalorder %s14_s14, 4   ;;  %s1803_s13 = smov %s1805_s15 }
 0x151   :  { %13 = sbr.rel (!%p11_p5) target bundleno = 2 (0x2), region = 85 }

</bundles_post_ra>
